<compile_context>
chip_gen: v7x
topology: tpu7x:2x2x1
jax: 0.10.0
libtpu: 0.0.40
codegen_flags: <defaults>
</compile_context>

<pallas_src>
import functools
import math

import jax
import jax.numpy as jnp
from jax.experimental import pallas as pl
from jax.experimental.pallas import tpu as pltpu


def _cdiv(a, b):
    return -(-a // b)


def _round_up(x, m):
    return _cdiv(x, m) * m


# -----------------------------------------------------------------------------
# Kernel
# -----------------------------------------------------------------------------
def make_siren_kernel():
    """Fused SIREN forward over one column tile of rows.

    x_ref  : (T, F_in)        natural row-major coordinate block
    w0_ref : (H, F_in)        first sine layer (30x pre-folded)
    wh_ref : (L, H, H)        hidden sine layers (30x pre-folded)
    bs_ref : (L+1, H, 1)      biases of all sine layers (30x pre-folded)
    wlt_ref: (H, F_out)       outermost linear weight, pre-transposed
    bl_ref : (F_out, 1)       outermost linear bias
    o_ref  : (F_out, T)       rows on the lane axis (lane-dense store)
    """

    def kernel(x_ref, w0_ref, wh_ref, bs_ref, wlt_ref, bl_ref, o_ref):
        num_hidden = wh_ref.shape[0]
        f_out = wlt_ref.shape[1]

        x = x_ref[...].astype(jnp.float32)                      # (T, F_in)

        # Layer 0: contract the minor dims of (H,F_in) x (T,F_in) -> (H,T).
        # This keeps the coords block in its natural layout (no materialized
        # transpose) while producing feature-major activations.
        z = jax.lax.dot_general(
            w0_ref[...], x, (((1,), (1,)), ((), ())),
            preferred_element_type=jnp.float32)                 # (H, T)
        z = z + bs_ref[0]                                       # (H,1) bcast over lanes
        h = jnp.sin(z)

        # Hidden sine layers on the MXU.
        for li in range(num_hidden):
            z = jnp.dot(wh_ref[li], h,
                        preferred_element_type=jnp.float32)     # (H, T)
            z = z + bs_ref[li + 1]
            h = jnp.sin(z)

        # Outermost linear layer.
        wlt = wlt_ref[...]                                      # (H, F_out)
        bl = bl_ref[...]                                        # (F_out, 1)
        if f_out == 1:
            # out=1 head: VPU multiply + XLU sublane reduce (skips ~20% of all
            # MXU pushes; exact f32).
            y = jnp.sum(wlt * h, axis=0, keepdims=True) + bl    # (1, T)
        else:
            y = jax.lax.dot_general(
                wlt, h, (((0,), (0,)), ((), ())),
                preferred_element_type=jnp.float32) + bl        # (F_out, T)

        o_ref[...] = y.astype(o_ref.dtype)

    return kernel


# -----------------------------------------------------------------------------
# Parameter construction (matches the PyTorch init scheme)
# -----------------------------------------------------------------------------
def init_siren_params(key, in_features, hidden_features, out_features,
                      num_hidden_layers):
    """SIREN init (first_layer_sine_init / sine_init + default nn.Linear bias
    init).  Weights in PyTorch (out, in) orientation, biases as (out, 1)."""
    dims = ([in_features] + [hidden_features] * (num_hidden_layers + 1)
            + [out_features])
    params = []
    for li, (fan_in, fan_out) in enumerate(zip(dims[:-1], dims[1:])):
        key, kw, kb = jax.random.split(key, 3)
        if li == 0:
            bound_w = 1.0 / fan_in                       # first_layer_sine_init
        else:
            bound_w = math.sqrt(6.0 / fan_in) / 30.0     # sine_init
        w = jax.random.uniform(kw, (fan_out, fan_in), jnp.float32,
                               minval=-bound_w, maxval=bound_w)
        bound_b = 1.0 / math.sqrt(fan_in)                # nn.Linear bias default
        b = jax.random.uniform(kb, (fan_out, 1), jnp.float32,
                               minval=-bound_b, maxval=bound_b)
        params.append((w, b))
    return params


def fold_sine_frequency(params, w0=30.0):
    """sin(30*(W h + b)) == sin((30W) h + (30b)); last (linear) layer untouched."""
    n = len(params)
    return [(w * w0, b * w0) if li < n - 1 else (w, b)
            for li, (w, b) in enumerate(params)]


def pack_params(folded_params):
    """Stack params into 5 arrays to minimize per-grid-step BlockSpec work.

    Returns (w0, w_hidden, b_sine, w_last_t, b_last):
      w0       : (H, F_in)
      w_hidden : (L, H, H)      L = num_hidden_layers
      b_sine   : (L+1, H, 1)    biases of all sine layers (incl. layer 0)
      w_last_t : (H, F_out)     outermost weight pre-transposed
      b_last   : (F_out, 1)
    """
    assert len(folded_params) >= 3, "expected first + >=1 hidden + last layer"
    w0, b0 = folded_params[0]
    hidden = folded_params[1:-1]
    w_last, b_last = folded_params[-1]
    w_hidden = jnp.stack([w for w, _ in hidden])
    b_sine = jnp.stack([b0] + [b for _, b in hidden])
    return (w0, w_hidden, b_sine, w_last.T, b_last)


# -----------------------------------------------------------------------------
# Tiling
# -----------------------------------------------------------------------------
def _choose_row_tile(M, requested):
    """Lane-dense row tile (multiple of 128), capped by available work,
    preferring >=2 grid steps and an even step count (v7x megacore balance)."""
    requested = max(128, (requested // 128) * 128)
    m128 = _round_up(M, 128)
    tile = min(requested, m128)

    # Prefer >=2 grid steps when there is enough work so the second
    # TensorCore (v7x) is not left idle.
    if m128 // tile < 2 and m128 >= 256:
        tile = _round_up(_cdiv(m128, 2), 128)

    # Prefer an even number of grid steps; only shrink the tile by <=2x.
    steps = _cdiv(m128, tile)
    if steps > 1 and steps % 2 == 1:
        cand = tile - 128
        while cand >= max(128, tile // 2):
            if _cdiv(m128, cand) % 2 == 0:
                tile = cand
                break
            cand -= 128
    return tile


# -----------------------------------------------------------------------------
# Forward wrapper
# -----------------------------------------------------------------------------
@functools.partial(jax.jit, static_argnames=("row_tile",))
def single_bvp_net_forward(coords, packed_params, row_tile=2048):
    """coords: (B, N, in_features) f32 -> (B, N, out_features) f32."""
    w0, w_hidden, b_sine, w_last_t, b_last = packed_params
    B, N, F_in = coords.shape
    H, _ = w0.shape
    num_hidden = w_hidden.shape[0]
    F_out = w_last_t.shape[1]

    M = B * N
    tile = _choose_row_tile(M, row_tile)
    steps = _cdiv(M, tile)
    M_pad = steps * tile

    # Natural layout (rows, features); only a ragged-tail pad, no transpose.
    x2d = coords.reshape(M, F_in)
    if M_pad != M:
        x2d = jnp.pad(x2d, ((0, M_pad - M), (0, 0)))

    in_specs = [
        pl.BlockSpec((tile, F_in), lambda i: (i, 0)),            # coords tile
        pl.BlockSpec(tuple(w0.shape), lambda i: (0, 0)),         # resident params
        pl.BlockSpec(tuple(w_hidden.shape), lambda i: (0, 0, 0)),
        pl.BlockSpec(tuple(b_sine.shape), lambda i: (0, 0, 0)),
        pl.BlockSpec(tuple(w_last_t.shape), lambda i: (0, 0)),
        pl.BlockSpec(tuple(b_last.shape), lambda i: (0, 0)),
    ]

    # Advisory cost estimate for XLA's scheduler.
    flops = 2 * M_pad * (H * F_in + num_hidden * H * H + H * F_out)
    transcendentals = M_pad * H * (num_hidden + 1)
    param_bytes = 4 * (int(w0.size) + int(w_hidden.size) + int(b_sine.size)
                       + int(w_last_t.size) + int(b_last.size))
    bytes_accessed = 4 * M_pad * (F_in + F_out) + param_bytes

    out = pl.pallas_call(
        make_siren_kernel(),
        out_shape=jax.ShapeDtypeStruct((F_out, M_pad), jnp.float32),
        grid=(steps,),
        in_specs=in_specs,
        out_specs=pl.BlockSpec((F_out, tile), lambda i: (0, i)),
        compiler_params=pltpu.CompilerParams(
            dimension_semantics=("parallel",)),
        cost_estimate=pl.CostEstimate(
            flops=flops,
            transcendentals=transcendentals,
            bytes_accessed=bytes_accessed),
    )(x2d, w0, w_hidden, b_sine, w_last_t, b_last)

    return out[:, :M].T.reshape(B, N, F_out)


# -----------------------------------------------------------------------------
# Pure-JAX reference (mirrors the PyTorch FCBlock forward, un-folded params)
# -----------------------------------------------------------------------------
def reference_forward(coords, raw_params):
    h = coords.astype(jnp.float32)
    n = len(raw_params)
    for li, (w, b) in enumerate(raw_params):
        h = jnp.einsum("bnf,of->bno", h, w) + b[:, 0]
        if li != n - 1:
            h = jnp.sin(30.0 * h)
    return h


if __name__ == "__main__":
    key = jax.random.PRNGKey(0)
    k_coords, k_coords2, k_params = jax.random.split(key, 3)

    in_features, hidden_features, out_features, num_hidden_layers = 2, 32, 1, 3

    raw_params = init_siren_params(k_params, in_features, hidden_features,
                                   out_features, num_hidden_layers)
    packed_params = pack_params(fold_sine_frequency(raw_params))

    # Small module-consistent case: batch=2, num_points=8, in_features=2.
    B, N = 2, 8
    coords = jax.random.uniform(k_coords, (B, N, in_features), jnp.float32,
                                minval=-1.0, maxval=1.0)
    out = jax.block_until_ready(single_bvp_net_forward(coords, packed_params))
    ref = reference_forward(coords, raw_params)
    assert out.shape == (B, N, out_features), out.shape
    assert jnp.allclose(out, ref, atol=1e-4, rtol=1e-4), \
        float(jnp.max(jnp.abs(out - ref)))

    # Larger ragged case: exercises the multi-step grid, even-step tile
    # choice and the padded tail block.
    B2, N2 = 2, 1500
    coords2 = jax.random.uniform(k_coords2, (B2, N2, in_features), jnp.float32,
                                 minval=-1.0, maxval=1.0)
    out2 = jax.block_until_ready(single_bvp_net_forward(coords2, packed_params))
    ref2 = reference_forward(coords2, raw_params)
    assert out2.shape == (B2, N2, out_features), out2.shape
    assert jnp.allclose(out2, ref2, atol=1e-4, rtol=1e-4), \
        float(jnp.max(jnp.abs(out2 - ref2)))

    print("KERNEL_OK")
</pallas_src>

<mosaic_0001>
module attributes {stable_mosaic.version = 11 : i64} {
  func.func @kernel(%arg0: i32, %arg1: memref<128x2xf32, #tpu.memory_space<vmem>>, %arg2: memref<32x2xf32, #tpu.memory_space<vmem>>, %arg3: memref<3x32x32xf32, #tpu.memory_space<vmem>>, %arg4: memref<4x32x1xf32, #tpu.memory_space<vmem>>, %arg5: memref<32x1xf32, #tpu.memory_space<vmem>>, %arg6: memref<1x1xf32, #tpu.memory_space<vmem>>, %arg7: memref<1x128xf32, #tpu.memory_space<vmem>>) attributes {dimension_semantics = [#tpu.dimension_semantics<parallel>], iteration_bounds = array<i64: 1>, scalar_prefetch = 0 : i64, scratch_operands = 0 : i64, tpu.core_type = #tpu.core_type<tc>, window_params = [{transform_indices = @transform_0, window_bounds = array<i64: 128, 2>}, {pipeline_mode = #tpu.pipeline_mode<synchronous>, transform_indices = @transform_1, window_bounds = array<i64: 32, 2>}, {pipeline_mode = #tpu.pipeline_mode<synchronous>, transform_indices = @transform_2, window_bounds = array<i64: 3, 32, 32>}, {pipeline_mode = #tpu.pipeline_mode<synchronous>, transform_indices = @transform_3, window_bounds = array<i64: 4, 32, 1>}, {pipeline_mode = #tpu.pipeline_mode<synchronous>, transform_indices = @transform_4, window_bounds = array<i64: 32, 1>}, {pipeline_mode = #tpu.pipeline_mode<synchronous>, transform_indices = @transform_5, window_bounds = array<i64: 1, 1>}, {transform_indices = @transform_6, window_bounds = array<i64: 1, 128>}]} {
    %c0 = arith.constant 0 : index
    %c0_0 = arith.constant 0 : index
    %0 = vector.load %arg1[%c0, %c0_0] : memref<128x2xf32, #tpu.memory_space<vmem>>, vector<128x2xf32>
    %c0_1 = arith.constant 0 : index
    %c0_2 = arith.constant 0 : index
    %1 = vector.load %arg2[%c0_1, %c0_2] : memref<32x2xf32, #tpu.memory_space<vmem>>, vector<32x2xf32>
    %cst = arith.constant dense<0.000000e+00> : vector<32x128xf32>
    %2 = tpu.matmul %1, %0, %cst {dimension_numbers = #tpu.dot_dimension_numbers<[1], [1], [0], [0], [0, 0, 1, 0], [], []>} : vector<32x2xf32>, vector<128x2xf32>, vector<32x128xf32> -> vector<32x128xf32>
    %c0_3 = arith.constant 0 : index
    %c0_4 = arith.constant 0 : index
    %c0_5 = arith.constant 0 : index
    %3 = vector.load %arg4[%c0_3, %c0_4, %c0_5] : memref<4x32x1xf32, #tpu.memory_space<vmem>>, vector<1x32x1xf32>
    %4 = vector.shape_cast %3 : vector<1x32x1xf32> to vector<32x1xf32>
    %5 = vector.broadcast %4 : vector<32x1xf32> to vector<32x128xf32>
    %6 = arith.addf %2, %5 : vector<32x128xf32>
    %7 = math.sin %6 : vector<32x128xf32>
    %c0_6 = arith.constant 0 : index
    %c0_7 = arith.constant 0 : index
    %c0_8 = arith.constant 0 : index
    %8 = vector.load %arg3[%c0_6, %c0_7, %c0_8] : memref<3x32x32xf32, #tpu.memory_space<vmem>>, vector<1x32x32xf32>
    %9 = vector.shape_cast %8 : vector<1x32x32xf32> to vector<32x32xf32>
    %cst_9 = arith.constant dense<0.000000e+00> : vector<32x128xf32>
    %10 = tpu.matmul %9, %7, %cst_9 {dimension_numbers = #tpu.dot_dimension_numbers<[1], [0], [0], [1], [0, 0, 1, 1], [], []>} : vector<32x32xf32>, vector<32x128xf32>, vector<32x128xf32> -> vector<32x128xf32>
    %c1 = arith.constant 1 : index
    %c0_10 = arith.constant 0 : index
    %c0_11 = arith.constant 0 : index
    %11 = vector.load %arg4[%c1, %c0_10, %c0_11] : memref<4x32x1xf32, #tpu.memory_space<vmem>>, vector<1x32x1xf32>
    %12 = vector.shape_cast %11 : vector<1x32x1xf32> to vector<32x1xf32>
    %13 = vector.broadcast %12 : vector<32x1xf32> to vector<32x128xf32>
    %14 = arith.addf %10, %13 : vector<32x128xf32>
    %15 = math.sin %14 : vector<32x128xf32>
    %c1_12 = arith.constant 1 : index
    %c0_13 = arith.constant 0 : index
    %c0_14 = arith.constant 0 : index
    %16 = vector.load %arg3[%c1_12, %c0_13, %c0_14] : memref<3x32x32xf32, #tpu.memory_space<vmem>>, vector<1x32x32xf32>
    %17 = vector.shape_cast %16 : vector<1x32x32xf32> to vector<32x32xf32>
    %cst_15 = arith.constant dense<0.000000e+00> : vector<32x128xf32>
    %18 = tpu.matmul %17, %15, %cst_15 {dimension_numbers = #tpu.dot_dimension_numbers<[1], [0], [0], [1], [0, 0, 1, 1], [], []>} : vector<32x32xf32>, vector<32x128xf32>, vector<32x128xf32> -> vector<32x128xf32>
    %c2 = arith.constant 2 : index
    %c0_16 = arith.constant 0 : index
    %c0_17 = arith.constant 0 : index
    %19 = vector.load %arg4[%c2, %c0_16, %c0_17] : memref<4x32x1xf32, #tpu.memory_space<vmem>>, vector<1x32x1xf32>
    %20 = vector.shape_cast %19 : vector<1x32x1xf32> to vector<32x1xf32>
    %21 = vector.broadcast %20 : vector<32x1xf32> to vector<32x128xf32>
    %22 = arith.addf %18, %21 : vector<32x128xf32>
    %23 = math.sin %22 : vector<32x128xf32>
    %c2_18 = arith.constant 2 : index
    %c0_19 = arith.constant 0 : index
    %c0_20 = arith.constant 0 : index
    %24 = vector.load %arg3[%c2_18, %c0_19, %c0_20] : memref<3x32x32xf32, #tpu.memory_space<vmem>>, vector<1x32x32xf32>
    %25 = vector.shape_cast %24 : vector<1x32x32xf32> to vector<32x32xf32>
    %cst_21 = arith.constant dense<0.000000e+00> : vector<32x128xf32>
    %26 = tpu.matmul %25, %23, %cst_21 {dimension_numbers = #tpu.dot_dimension_numbers<[1], [0], [0], [1], [0, 0, 1, 1], [], []>} : vector<32x32xf32>, vector<32x128xf32>, vector<32x128xf32> -> vector<32x128xf32>
    %c3 = arith.constant 3 : index
    %c0_22 = arith.constant 0 : index
    %c0_23 = arith.constant 0 : index
    %27 = vector.load %arg4[%c3, %c0_22, %c0_23] : memref<4x32x1xf32, #tpu.memory_space<vmem>>, vector<1x32x1xf32>
    %28 = vector.shape_cast %27 : vector<1x32x1xf32> to vector<32x1xf32>
    %29 = vector.broadcast %28 : vector<32x1xf32> to vector<32x128xf32>
    %30 = arith.addf %26, %29 : vector<32x128xf32>
    %31 = math.sin %30 : vector<32x128xf32>
    %c0_24 = arith.constant 0 : index
    %c0_25 = arith.constant 0 : index
    %32 = vector.load %arg5[%c0_24, %c0_25] : memref<32x1xf32, #tpu.memory_space<vmem>>, vector<32x1xf32>
    %c0_26 = arith.constant 0 : index
    %c0_27 = arith.constant 0 : index
    %33 = vector.load %arg6[%c0_26, %c0_27] : memref<1x1xf32, #tpu.memory_space<vmem>>, vector<1x1xf32>
    %34 = vector.broadcast %32 : vector<32x1xf32> to vector<32x128xf32>
    %35 = arith.mulf %34, %31 : vector<32x128xf32>
    %cst_28 = arith.constant dense<0.000000e+00> : vector<128xf32>
    %36 = vector.multi_reduction <add>, %35, %cst_28 [0] : vector<32x128xf32> to vector<128xf32>
    %37 = vector.shape_cast %36 : vector<128xf32> to vector<1x128xf32>
    %38 = vector.broadcast %33 : vector<1x1xf32> to vector<1x128xf32>
    %39 = arith.addf %37, %38 : vector<1x128xf32>
    %c0_29 = arith.constant 0 : index
    %c0_30 = arith.constant 0 : index
    %40 = vector.load %arg7[%c0_29, %c0_30] : memref<1x128xf32, #tpu.memory_space<vmem>>, vector<1x128xf32>
    tpu.vector_store %arg7[%c0_29, %c0_30], %39 {strides = array<i32>} : memref<1x128xf32, #tpu.memory_space<vmem>>, vector<1x128xf32>,
    return
  }
  func.func @transform_0(%arg0: i32) -> (i32, i32) {
    %c0_i32 = arith.constant 0 : i32
    %c0_i32_0 = arith.constant 0 : i32
    return %arg0, %c0_i32 : i32, i32
  }
  func.func @transform_1(%arg0: i32) -> (i32, i32) {
    %c0_i32 = arith.constant 0 : i32
    %c0_i32_0 = arith.constant 0 : i32
    %c0_i32_1 = arith.constant 0 : i32
    return %c0_i32, %c0_i32_0 : i32, i32
  }
  func.func @transform_2(%arg0: i32) -> (i32, i32, i32) {
    %c0_i32 = arith.constant 0 : i32
    %c0_i32_0 = arith.constant 0 : i32
    %c0_i32_1 = arith.constant 0 : i32
    %c0_i32_2 = arith.constant 0 : i32
    return %c0_i32, %c0_i32_0, %c0_i32_1 : i32, i32, i32
  }
  func.func @transform_3(%arg0: i32) -> (i32, i32, i32) {
    %c0_i32 = arith.constant 0 : i32
    %c0_i32_0 = arith.constant 0 : i32
    %c0_i32_1 = arith.constant 0 : i32
    %c0_i32_2 = arith.constant 0 : i32
    return %c0_i32, %c0_i32_0, %c0_i32_1 : i32, i32, i32
  }
  func.func @transform_4(%arg0: i32) -> (i32, i32) {
    %c0_i32 = arith.constant 0 : i32
    %c0_i32_0 = arith.constant 0 : i32
    %c0_i32_1 = arith.constant 0 : i32
    return %c0_i32, %c0_i32_0 : i32, i32
  }
  func.func @transform_5(%arg0: i32) -> (i32, i32) {
    %c0_i32 = arith.constant 0 : i32
    %c0_i32_0 = arith.constant 0 : i32
    %c0_i32_1 = arith.constant 0 : i32
    return %c0_i32, %c0_i32_0 : i32, i32
  }
  func.func @transform_6(%arg0: i32) -> (i32, i32) {
    %c0_i32 = arith.constant 0 : i32
    %c0_i32_0 = arith.constant 0 : i32
    return %c0_i32, %arg0 : i32, i32
  }
}

</mosaic_0001>

<bundles_post_ra>
// kernel: single_bvp_net_forward.1
= control target key start
LH: loop header
LB: loop body
LE: loop exit
PB: predicated region body
PF: predicated region fallthrough
CT: control target
= control target key end

     0   :  { %vm69_vm0 = vcmask 15360   ;;  %v2762_v3 = vmov 0   ;;  %vm660_vm14 = vcmask 261120   ;;  %s4159_s0 = inlined_call_operand.vmem [shape: f32[128,2], index: 0, kind: input, shape index: {}]   ;;  %s4160_s5 = inlined_call_operand.<no memory space> [shape: f32[1,1], index: 5, kind: input, shape index: {}]   ;;  %s4161_s1 = inlined_call_operand.vmem [shape: f32[32,2], index: 1, kind: input, shape index: {}]   ;;  %s4162_s3 = inlined_call_operand.vmem [shape: f32[4,32,1], index: 3, kind: input, shape index: {}]   ;;  %s4163_s4 = inlined_call_operand.vmem [shape: f32[32,1], index: 4, kind: input, shape index: {}]   ;;  %s4164_s2 = inlined_call_operand.vmem [shape: f32[3,32,32], index: 2, kind: input, shape index: {}]   ;;  %s4165_s6 = inlined_call_operand.vmem [shape: f32[1,128], index: 6, kind: output, shape index: {}]  }
   0x1   :  { %v25_v0 = vld [vmem:[%s4159_s0] sm:$0xff]  ;;  %v26_v1 = vld [vmem:[%s4159_s0 + $0x8] sm:$0xff]  ;;  %vm2812_vm1 = vmpackc.low %vm69_vm0, %vm69_vm0  ;;  %2696 = vset.pattern.permute.xlu0 %v2762_v3  ;;  %2697 = vset.pattern.permute.xlu1 %v2762_v3  ;;  %v11_v4 = vstv %s4160_s5 }
   0x2   :  { %v2553_v5 = vpack.c.bf16 %v26_v1, %v25_v0  ;;  %v27_v6 = vld [vmem:[%s4159_s0 + $0x10] sm:$0xff]  ;;  %v28_v7 = vld [vmem:[%s4159_s0 + $0x18] sm:$0xff]  ;;  %12 = vst [vmem:[#allocation2] sm:$0x1] %v11_v4  ;;  %v41_v9 = vld [vmem:[%s4161_s1] sm:$0xff] }
   0x3   :  { %v2559_v8 = vpack.c.bf16 %v28_v7, %v27_v6  ;;  %v29_v10 = vld [vmem:[%s4159_s0 + $0x20] sm:$0xff]  ;;  %v30_v11 = vld [vmem:[%s4159_s0 + $0x28] sm:$0xff]  ;;  %2505 = vmatprep.mubr.msk.f32.mxu0 %vm69_vm0, %v41_v9  ;;  %v47_v13 = vld [vmem:[%s4162_s3 + $0x10] sm:$0xff] }
   0x4   :  { %2555 = vmatprep.subr.msk.bf16.mxu0 %vm2812_vm1, %v2553_v5  ;;  %v45_v12 = vld [vmem:[%s4162_s3] sm:$0xff]  ;;  %61 = vperm.xlu1 %2697, %v47_v13   ;;  %v2565_v14 = vpack.c.bf16 %v30_v11, %v29_v10  ;;  %v46_v15 = vld [vmem:[%s4162_s3 + $0x8] sm:$0xff]  ;;  %v48_v16 = vld [vmem:[%s4162_s3 + $0x18] sm:$0xff] }
   0x5   :  { %2558 = vmatpush3.bf16.xpose.msk.msra.mxu0 %vm2812_vm1, %v2553_v5  ;;  %51 = vperm.xlu0 %2696, %v45_v12   ;;  %v2349_v17 = vld [vmem:[%s4162_s3 + $0x20] sm:$0xff]  ;;  %v31_v18 = vld [vmem:[%s4159_s0 + $0x30] sm:$0xff]  ;;  %v32_v19 = vld [vmem:[%s4159_s0 + $0x38] sm:$0xff] }
   0x6   :  { %2561 = vmatprep.subr.msk.bf16.mxu0 %vm2812_vm1, %v2559_v8  ;;  %v2350_v20 = vld [vmem:[%s4162_s3 + $0x28] sm:$0xff]  ;;  %v2571_v21 = vpack.c.bf16 %v32_v19, %v31_v18  ;;  %v2351_v22 = vld [vmem:[%s4162_s3 + $0x30] sm:$0xff]  ;;  %v2352_v23 = vld [vmem:[%s4162_s3 + $0x38] sm:$0xff] }
   0x7   :  { %v2377_v24 = vld [vmem:[%s4162_s3 + $0x40] sm:$0xff]  ;;  %v34_v26 = vld [vmem:[%s4159_s0 + $0x48] sm:$0xff]  ;;  %v2379_v29 = vld [vmem:[%s4162_s3 + $0x50] sm:$0xff] }
   0x8   :  { %66 = vperm.xlu1 %2697, %v48_v16   ;;  %v33_v25 = vld [vmem:[%s4159_s0 + $0x40] sm:$0xff]  ;;  %v2378_v27 = vld [vmem:[%s4162_s3 + $0x48] sm:$0xff]  ;;  %v2380_v30 = vld [vmem:[%s4162_s3 + $0x58] sm:$0xff] }
   0x9   :  { %56 = vperm.xlu0 %2696, %v46_v15   ;;  %v2577_v28 = vpack.c.bf16 %v34_v26, %v33_v25  ;;  %v2405_v31 = vld [vmem:[%s4162_s3 + $0x60] sm:$0xff]  ;;  %v35_v32 = vld [vmem:[%s4159_s0 + $0x50] sm:$0xff]  ;;  %v36_v33 = vld [vmem:[%s4159_s0 + $0x58] sm:$0xff] }
   0xa   :  { %v2406_v34 = vld [vmem:[%s4162_s3 + $0x68] sm:$0xff]  ;;  %v2583_v35 = vpack.c.bf16 %v36_v33, %v35_v32  ;;  %v2407_v36 = vld [vmem:[%s4162_s3 + $0x70] sm:$0xff]  ;;  %v2408_v37 = vld [vmem:[%s4162_s3 + $0x78] sm:$0xff]  ;;  %v2764_v33 = vmov 2475754826  }
   0xb   :  { %v2260_v38 = vld [vmem:[%s4163_s4] sm:$0xff]  ;;  %v38_v40 = vld [vmem:[%s4159_s0 + $0x68] sm:$0xff]  ;;  %v2262_v43 = vld [vmem:[%s4163_s4 + $0x10] sm:$0xff] }
   0xc   :  { %647 = vperm.xlu1 %2697, %v2350_v20   ;;  %v37_v39 = vld [vmem:[%s4159_s0 + $0x60] sm:$0xff]  ;;  %v2261_v41 = vld [vmem:[%s4163_s4 + $0x8] sm:$0xff]  ;;  %v2263_v44 = vld [vmem:[%s4163_s4 + $0x18] sm:$0xff] }
   0xd   :  { %2564 = vmatpush3.bf16.xpose.msk.msra.mxu0 %vm2812_vm1, %v2559_v8  ;;  %642 = vperm.xlu0 %2696, %v2349_v17   ;;  %v2589_v42 = vpack.c.bf16 %v38_v40, %v37_v39  ;;  %v2264_v45 = vld [vmem:[#allocation2] sm:$0x1]  ;;  %v39_v46 = vld [vmem:[%s4159_s0 + $0x70] sm:$0xff]  ;;  %v40_v47 = vld [vmem:[%s4159_s0 + $0x78] sm:$0xff]  ;;  %v2767_v40 = vmov 920167782  }
   0xe   :  { %2567 = vmatprep.subr.msk.bf16.mxu0 %vm2812_vm1, %v2565_v14  ;;  %v2595_v48 = vpack.c.bf16 %v40_v47, %v39_v46  ;;  %v42_v49 = vld [vmem:[%s4161_s1 + $0x8] sm:$0xff]  ;;  %v43_v50 = vld [vmem:[%s4161_s1 + $0x10] sm:$0xff]  ;;  %v44_v51 = vld [vmem:[%s4161_s1 + $0x18] sm:$0xff]  ;;  %v2768_v47 = vmov 1326507024  }
  0x10   :  { %657 = vperm.xlu1 %2697, %v2352_v23  }
  0x11   :  { %652 = vperm.xlu0 %2696, %v2351_v22  }
  0x14   :  { %1191 = vperm.xlu1 %2697, %v2378_v27  }
  0x15   :  { %2570 = vmatpush3.bf16.xpose.msk.msra.mxu0 %vm2812_vm1, %v2565_v14  ;;  %1186 = vperm.xlu0 %2696, %v2377_v24  }
  0x16   :  { %2573 = vmatprep.subr.msk.bf16.mxu0 %vm2812_vm1, %v2571_v21 }
  0x18   :  { %1201 = vperm.xlu1 %2697, %v2380_v30  }
  0x19   :  { %1196 = vperm.xlu0 %2696, %v2379_v29  }
  0x1c   :  { %1734 = vperm.xlu1 %2697, %v2406_v34  }
  0x1d   :  { %2576 = vmatpush3.bf16.xpose.msk.msra.mxu0 %vm2812_vm1, %v2571_v21  ;;  %1729 = vperm.xlu0 %2696, %v2405_v31   ;;  %v2763_v31 = vmov 683565275  }
  0x1e   :  { %2579 = vmatprep.subr.msk.bf16.mxu0 %vm2812_vm1, %v2577_v28 }
  0x20   :  { %1744 = vperm.xlu1 %2697, %v2408_v37  }
  0x21   :  { %1739 = vperm.xlu0 %2696, %v2407_v36   ;;  %v2765_v36 = vmov 2131351028  }
  0x24   :  { %2272 = vperm.xlu1 %2697, %v2261_v41  }
  0x25   :  { %2582 = vmatpush3.bf16.xpose.msk.msra.mxu0 %vm2812_vm1, %v2577_v28  ;;  %2267 = vperm.xlu0 %2696, %v2260_v38   ;;  %v2766_v38 = vmov 2102212464  }
  0x26   :  { %2585 = vmatprep.subr.msk.bf16.mxu0 %vm2812_vm1, %v2583_v35 }
  0x28   :  { %2282 = vperm.xlu1 %2697, %v2263_v44  }
  0x29   :  { %2277 = vperm.xlu0 %2696, %v2262_v43  }
  0x2d   :  { %2588 = vmatpush3.bf16.xpose.msk.msra.mxu0 %vm2812_vm1, %v2583_v35  ;;  %2300 = vperm.xlu0 %2696, %v2264_v45  }
  0x2e   :  { %2591 = vmatprep.subr.msk.bf16.mxu0 %vm2812_vm1, %v2589_v42 }
  0x35   :  { %2594 = vmatpush3.bf16.xpose.msk.msra.mxu0 %vm2812_vm1, %v2589_v42 }
  0x36   :  { %2597 = vmatprep.subr.msk.bf16.mxu0 %vm2812_vm1, %v2595_v48 }
  0x3d   :  { %2600 = vmatpush3.bf16.xpose.msk.msra.mxu0 %vm2812_vm1, %v2595_v48 }
  0x44   :  { %2506 = vmatmul.mubr.msk.f32.vlgmr.msra.gmra.mrb[0].mxu0 %vm69_vm0, %v42_v49 }
  0x45   :  { %2508 = vmatprep.mubr.msk.f32.mxu0 %vm69_vm0, %v43_v50 }
  0x48   :  { %2509 = vmatmul.mubr.msk.f32.gmra.mrb[2].mxu0 %vm69_vm0, %v44_v51 }
  0x83   :  { %v62_v53 = vpop.permute.xlu1 %61 }
  0x84   :  { %v52_v52 = vpop.permute.xlu0 %51 }
  0x87   :  { %v67_v61 = vpop.permute.xlu1 %66 }
  0x88   :  { %v57_v54 = vpop.permute.xlu0 %56 }
 0x117   :  { %v2507_v55 = vpop.f32.mrb[0].mxu0 }
 0x118   :  { %v2969_v56 = vadd.f32 %v2507_v55, %v57_v54  ;;  %v196_v57 = vpop.f32.mrb[1].mxu0 }
 0x119   :  { %v2971_v58 = vadd.f32 %v196_v57, %v52_v52 }
 0x11a   :  { %v319_v59 = vand.u32 2147483647, %v2969_v56  ;;  %v322_v60 = vand.u32 2139095040, %v2969_v56 }
 0x11b   :  { %v215_v62 = vand.u32 2147483647, %v2971_v58  ;;  %v218_v63 = vand.u32 2139095040, %v2971_v58  ;;  %v2510_v0 = vpop.f32.mrb[2].mxu0 }
 0x11c   :  { %v323_v1 = vshrl.u32 %v322_v60, 23  ;;  %v326_v2 = vand.u32 8388607, %v319_v59  ;;  %v2979_v3 = vadd.f32 %v2510_v0, %v67_v61  ;;  %v206_v4 = vpop.f32.mrb[3].mxu0 }
 0x11d   :  { %v219_v5 = vshrl.u32 %v218_v63, 23  ;;  %v222_v6 = vand.u32 8388607, %v215_v62  ;;  %v2984_v9 = vadd.f32 %v206_v4, %v62_v53 }
 0x11e   :  { %v2337_v7 = vadd.s32 4294967169, %v323_v1  ;;  %v527_v8 = vand.u32 2147483647, %v2979_v3  ;;  %v327_v10 = vor.u32 8388608, %v326_v2  ;;  %v530_v12 = vand.u32 2139095040, %v2979_v3 }
 0x11f   :  { %v2333_v11 = vadd.s32 4294967169, %v219_v5  ;;  %v223_v14 = vor.u32 8388608, %v222_v6  ;;  %v423_v18 = vand.u32 2147483647, %v2984_v9  ;;  %v426_v29 = vand.u32 2139095040, %v2984_v9 }
 0x120   :  { %v329_v13 = vadd.s32 1, %v2337_v7  ;;  %v531_v16 = vshrl.u32 %v530_v12, 23  ;;  %v2989_v17 = vand.u32 8388607, %v527_v8  ;;  %v2992_v20 = vshll.u32 %v327_v10, 8 }
 0x121   :  { %v225_v15 = vadd.s32 1, %v2333_v11  ;;  %v2994_v25 = vshll.u32 %v223_v14, 8 }
 0x122   :  { %vm330_vm2 = vcmp.gt.s32.totalorder %v329_v13, 0  ;;  %v2345_v21 = vadd.s32 4294967169, %v531_v16  ;;  %v535_v28 = vor.u32 8388608, %v2989_v17 }
 0x123   :  { %v331_v19 = vsel %vm330_vm2, %v329_v13, 0  ;;  %vm226_vm3 = vcmp.gt.s32.totalorder %v225_v15, 0 }
 0x124   :  { %v332_v22 = vshrl.u32 %v331_v19, 5  ;;  %v333_v23 = vand.u32 31, %v331_v19  ;;  %v227_v24 = vsel %vm226_vm3, %v225_v15, 0  ;;  %v3002_v35 = vadd.s32 1, %v2345_v21 }
 0x125   :  { %v2996_v26 = vshrl.u32 %v227_v24, 5  ;;  %v229_v27 = vand.u32 31, %v227_v24 }
 0x126   :  { %v334_v30 = vsub.s32 32, %v333_v23  ;;  %v336_v32 = vshll.u32 %v2763_v31, %v333_v23  ;;  %v339_v34 = vshll.u32 %v2764_v33, %v333_v23  ;;  %v342_v37 = vshll.u32 %v2765_v36, %v333_v23 }
 0x127   :  { %v345_v39 = vshll.u32 %v2766_v38, %v333_v23  ;;  %v348_v41 = vshll.u32 %v2767_v40, %v333_v23  ;;  %vm351_vm4 = vcmp.lt.s32.totalorder %v332_v22, 1  ;;  %vm352_vm5 = vcmp.lt.s32.totalorder %v332_v22, 2 }
 0x128   :  { %v337_v42 = vshrl.u32 %v2764_v33, %v334_v30  ;;  %v340_v43 = vshrl.u32 %v2765_v36, %v334_v30  ;;  %v343_v44 = vshrl.u32 %v2766_v38, %v334_v30  ;;  %v335_v45 = vshrl.u32 %v2763_v31, %v334_v30 }
 0x129   :  { %v346_v46 = vshrl.u32 %v2767_v40, %v334_v30  ;;  %v349_v48 = vshrl.u32 %v2768_v47, %v334_v30  ;;  %vm353_vm6 = vcmp.lt.s32.totalorder %v332_v22, 3  ;;  %v230_v52 = vsub.s32 32, %v229_v27 }
 0x12a   :  { %v338_v49 = vor.u32 %v337_v42, %v336_v32  ;;  %v341_v50 = vor.u32 %v340_v43, %v339_v34  ;;  %v344_v51 = vor.u32 %v343_v44, %v342_v37  ;;  %vm354_vm7 = vcmp.lt.s32.totalorder %v332_v22, 4 }
 0x12b   :  { %v347_v53 = vor.u32 %v346_v46, %v345_v39  ;;  %v350_v54 = vor.u32 %v349_v48, %v348_v41  ;;  %v232_v55 = vshll.u32 %v2763_v31, %v229_v27  ;;  %v235_v4 = vshll.u32 %v2764_v33, %v229_v27 }
 0x12c   :  { %v355_v57 = vsel %vm351_vm4, %v335_v45, %v338_v49  ;;  %v356_v60 = vsel %vm354_vm7, %v344_v51, 2102212464  ;;  %v359_v61 = vsel %vm351_vm4, %v338_v49, %v341_v50  ;;  %v363_v63 = vsel %vm351_vm4, %v341_v50, %v344_v51 }
 0x12d   :  { %v357_v0 = vsel %vm353_vm6, %v341_v50, %v356_v60  ;;  %v360_v1 = vsel %vm354_vm7, %v347_v53, 920167782  ;;  %v364_v2 = vsel %vm354_vm7, %v350_v54, 1326507024  ;;  %v231_v7 = vshrl.u32 %v2763_v31, %v230_v52 }
 0x12e   :  { %v361_v5 = vsel %vm353_vm6, %v344_v51, %v360_v1  ;;  %v365_v6 = vsel %vm353_vm6, %v347_v53, %v364_v2  ;;  %v233_v10 = vshrl.u32 %v2764_v33, %v230_v52  ;;  %v358_v11 = vsel %vm352_vm5, %v355_v57, %v357_v0 }
 0x12f   :  { %v362_v12 = vsel %vm352_vm5, %v359_v61, %v361_v5  ;;  %v366_v13 = vsel %vm352_vm5, %v363_v63, %v365_v6  ;;  %v236_v14 = vshrl.u32 %v2765_v36, %v230_v52  ;;  %v238_v30 = vshll.u32 %v2765_v36, %v229_v27 }
 0x130   :  { %v3028_v15 = vmul.u32.u64.low %v2992_v20, %v366_v13  ;;  %v3029_v16 = vmul.u32.u64.high %v2992_v20, %v366_v13, %v3028_v15  ;;  %v3032_v19 = vmul.u32.u64.low %v2992_v20, %v362_v12  ;;  %v3033_v21 = vmul.u32.u64.high %v2992_v20, %v362_v12, %v3032_v19 }
 0x131   :  { %v234_v23 = vor.u32 %v233_v10, %v232_v55  ;;  %v237_v24 = vor.u32 %v236_v14, %v235_v4  ;;  %v239_v32 = vshrl.u32 %v2766_v38, %v230_v52  ;;  %v374_v22 = vmul.u32 %v2992_v20, %v358_v11 }
 0x132   :  { %v241_v34 = vshll.u32 %v2766_v38, %v229_v27  ;;  %v242_v37 = vshrl.u32 %v2767_v40, %v230_v52  ;;  %v245_v39 = vshrl.u32 %v2768_v47, %v230_v52  ;;  %v244_v42 = vshll.u32 %v2767_v40, %v229_v27 }
 0x133   :  { %v240_v41 = vor.u32 %v239_v32, %v238_v30  ;;  %vm247_vm8 = vcmp.lt.s32.totalorder %v2996_v26, 1  ;;  %vm248_vm9 = vcmp.lt.s32.totalorder %v2996_v26, 2  ;;  %vm376_vm10 = vc.u32 %v3029_v16, %v3032_v19 }
 0x134   :  { %v377_v43 = vadd.s32 1, %v3033_v21  ;;  %v243_v44 = vor.u32 %v242_v37, %v241_v34  ;;  %vm249_vm11 = vcmp.lt.s32.totalorder %v2996_v26, 3  ;;  %v246_v20 = vor.u32 %v245_v39, %v244_v42 }
 0x135   :  { %vm250_vm12 = vcmp.lt.s32.totalorder %v2996_v26, 4  ;;  %v251_v45 = vsel %vm247_vm8, %v231_v7, %v234_v23  ;;  %v255_v46 = vsel %vm247_vm8, %v234_v23, %v237_v24  ;;  %v259_v50 = vsel %vm247_vm8, %v237_v24, %v240_v41  ;;  %v631_v7 = vld [vmem:[%s4164_s2] sm:$0xff] }
 0x136   :  { %v378_v48 = vsel %vm376_vm10, %v377_v43, %v3033_v21  ;;  %v252_v27 = vsel %vm250_vm12, %v240_v41, 2102212464  ;;  %v256_v49 = vsel %vm250_vm12, %v243_v44, 920167782  ;;  %v260_v54 = vsel %vm250_vm12, %v246_v20, 1326507024  ;;  %2519 = vmatprep.mubr.msk.f32.mxu1 %vm660_vm14, %v631_v7 }
 0x137   :  { %v379_v51 = vadd.s32 %v378_v48, %v374_v22  ;;  %v253_v52 = vsel %vm249_vm11, %v237_v24, %v252_v27  ;;  %v257_v53 = vsel %vm249_vm11, %v240_v41, %v256_v49  ;;  %v261_v60 = vsel %vm249_vm11, %v243_v44, %v260_v54 }
 0x138   :  { %v254_v55 = vsel %vm248_vm9, %v251_v45, %v253_v52  ;;  %v258_v57 = vsel %vm248_vm9, %v255_v46, %v257_v53  ;;  %vm538_vm13 = vcmp.gt.s32.totalorder %v3002_v35, 0  ;;  %v262_v63 = vsel %vm248_vm9, %v259_v50, %v261_v60 }
 0x139   :  { %v380_v61 = vadd.s32 536870912, %v379_v51  ;;  %v3065_v0 = vmul.u32.u64.low %v2994_v25, %v258_v57  ;;  %v3066_v1 = vmul.u32.u64.high %v2994_v25, %v258_v57, %v3065_v0  ;;  %v539_v5 = vsel %vm538_vm13, %v3002_v35, 0 }
 0x13a   :  { %v3070_v2 = vmul.u32.u64.low %v2994_v25, %v262_v63  ;;  %v3071_v4 = vmul.u32.u64.high %v2994_v25, %v262_v63, %v3070_v2  ;;  %v427_v6 = vshrl.u32 %v426_v29, 23  ;;  %v541_v10 = vand.u32 31, %v539_v5 }
 0x13b   :  { %v3079_v26 = vshrl.u32 %v380_v61, 30  ;;  %v270_v11 = vmul.u32 %v2994_v25, %v254_v55  ;;  %v3084_v12 = vshll.u32 %v535_v28, 8  ;;  %v3088_v13 = vand.u32 8388607, %v423_v18 }
 0x13c   :  { %v273_v35 = vadd.s32 1, %v3066_v1  ;;  %v540_v14 = vshrl.u32 %v539_v5, 5  ;;  %v542_v15 = vsub.s32 32, %v541_v10  ;;  %vm272_vm15 = vc.u32 %v3071_v4, %v3065_v0 }
 0x13d   :  { %v382_v29 = vshll.u32 %v3079_v26, 30  ;;  %v544_v17 = vshll.u32 %v2763_v31, %v541_v10  ;;  %v547_v25 = vshll.u32 %v2764_v33, %v541_v10  ;;  %v2341_v28 = vadd.s32 4294967169, %v427_v6 }
 0x13e   :  { %v274_v23 = vsel %vm272_vm15, %v273_v35, %v3066_v1  ;;  %v545_v24 = vshrl.u32 %v2764_v33, %v542_v15  ;;  %v550_v30 = vshll.u32 %v2765_v36, %v541_v10  ;;  %v548_v22 = vshrl.u32 %v2765_v36, %v542_v15 }
 0x13f   :  { %v3097_v21 = vsub.s32 %v379_v51, %v382_v29  ;;  %v275_v32 = vadd.s32 %v274_v23, %v270_v11  ;;  %v551_v34 = vshrl.u32 %v2766_v38, %v542_v15  ;;  %v553_v37 = vshll.u32 %v2766_v38, %v541_v10 }
 0x140   :  { %v546_v41 = vor.u32 %v545_v24, %v544_v17  ;;  %v554_v42 = vshrl.u32 %v2767_v40, %v542_v15  ;;  %v556_v43 = vshll.u32 %v2767_v40, %v541_v10  ;;  %v549_v20 = vor.u32 %v548_v22, %v547_v25 }
 0x141   :  { %v385_v39 = vsub.s32 0, %v3097_v21  ;;  %v276_v44 = vadd.s32 536870912, %v275_v32  ;;  %v552_v45 = vor.u32 %v551_v34, %v550_v30  ;;  %v557_v46 = vshrl.u32 %v2768_v47, %v542_v15 }
 0x142   :  { %v543_v27 = vshrl.u32 %v2763_v31, %v542_v15  ;;  %v555_v49 = vor.u32 %v554_v42, %v553_v37  ;;  %vm559_vm0 = vcmp.lt.s32.totalorder %v540_v14, 1  ;;  %vm561_vm1 = vcmp.lt.s32.totalorder %v540_v14, 3 }
 0x143   :  { %v2338_v48 = vmin.u32 %v385_v39, %v3097_v21  ;;  %v277_v50 = vshrl.u32 %v276_v44, 30  ;;  %v558_v51 = vor.u32 %v557_v46, %v556_v43  ;;  %vm562_vm2 = vcmp.lt.s32.totalorder %v540_v14, 4 }
 0x144   :  { %v563_v53 = vsel %vm559_vm0, %v543_v27, %v546_v41  ;;  %v564_v54 = vsel %vm562_vm2, %v552_v45, 2102212464  ;;  %v567_v55 = vsel %vm559_vm0, %v546_v41, %v549_v20  ;;  %v568_v61 = vsel %vm562_vm2, %v555_v49, 920167782 }
 0x145   :  { %v387_v52 = vclz %v2338_v48  ;;  %v278_v57 = vshll.u32 %v277_v50, 30  ;;  %v565_v60 = vsel %vm561_vm1, %v549_v20, %v564_v54  ;;  %v571_v63 = vsel %vm559_vm0, %v549_v20, %v552_v45 }
 0x146   :  { %vm560_vm3 = vcmp.lt.s32.totalorder %v540_v14, 2  ;;  %v569_v2 = vsel %vm561_vm1, %v552_v45, %v568_v61  ;;  %v572_v5 = vsel %vm562_vm2, %v558_v51, 1326507024  ;;  %v375_v30 = vadd.s32 %v3032_v19, %v3029_v16 }
 0x147   :  { %v2339_v1 = vadd.s32 4294967294, %v387_v52  ;;  %v3113_v6 = vsub.s32 %v275_v32, %v278_v57  ;;  %v566_v7 = vsel %vm560_vm3, %v563_v53, %v565_v60  ;;  %v570_v10 = vsel %vm560_vm3, %v567_v55, %v569_v2 }
 0x148   :  { %v573_v11 = vsel %vm561_vm1, %v555_v49, %v572_v5  ;;  %v3117_v35 = vmul.u32.u64.low %v3084_v12, %v570_v10  ;;  %v3118_v15 = vmul.u32.u64.high %v3084_v12, %v570_v10, %v3117_v35  ;;  %v433_v22 = vadd.s32 1, %v2341_v28 }
 0x149   :  { %vm2340_vm4 = vcmp.lt.s32.totalorder %v2339_v1, 0  ;;  %v574_v29 = vsel %vm560_vm3, %v571_v63, %v573_v11  ;;  %v281_v25 = vsub.s32 0, %v3113_v6  ;;  %v582_v39 = vmul.u32 %v3084_v12, %v566_v7 }
 0x14a   :  { %v390_v17 = vsel %vm2340_vm4, 0, %v2339_v1  ;;  %v3123_v23 = vmul.u32.u64.low %v3084_v12, %v574_v29  ;;  %v3124_v24 = vmul.u32.u64.high %v3084_v12, %v574_v29, %v3123_v23  ;;  %v431_v41 = vor.u32 8388608, %v3088_v13 }
 0x14b   :  { %v391_v32 = vsub.s32 32, %v390_v17  ;;  %v395_v14 = vsub.s32 4294967266, %v390_v17  ;;  %v392_v34 = vshll.u32 %v3097_v21, %v390_v17  ;;  %v2334_v37 = vmin.u32 %v281_v25, %v3113_v6 }
 0x14c   :  { %v585_v44 = vadd.s32 1, %v3118_v15  ;;  %vm434_vm5 = vcmp.gt.s32.totalorder %v433_v22, 0  ;;  %vm584_vm6 = vc.u32 %v3124_v24, %v3117_v35  ;;  %v301_v19 = vsub.s32 4, %v277_v50 }
 0x14d   :  { %v393_v42 = vshrl.u32 %v375_v30, %v391_v32  ;;  %v396_v43 = vadd.s32 127, %v395_v14  ;;  %v283_v20 = vclz %v2334_v37  ;;  %v435_v16 = vsel %vm434_vm5, %v433_v22, 0 }
 0x14e   :  { %vm217_vm7 = vcmp.lt.s32.totalorder %v2971_v58, 0  ;;  %v586_v21 = vsel %vm584_vm6, %v585_v44, %v3118_v15  ;;  %v271_v12 = vadd.s32 %v3065_v0, %v3071_v4  ;;  %v437_v48 = vand.u32 31, %v435_v16 }
 0x14f   :  { %v394_v28 = vor.u32 %v393_v42, %v392_v34  ;;  %v397_v45 = vshll.u32 %v396_v43, 23  ;;  %v2335_v13 = vadd.s32 4294967294, %v283_v20  ;;  %v587_v46 = vadd.s32 %v586_v21, %v582_v39 }
 0x150   :  { %v3139_v49 = vshrl.u32 %v435_v16, 5  ;;  %v3141_v51 = vshll.u32 %v431_v41, 8  ;;  %v405_v52 = vsub.s32 4, %v3079_v26  ;;  %v438_v54 = vsub.s32 32, %v437_v48 }
 0x151   :  { %v398_v27 = vor.u32 4788187, %v397_v45  ;;  %vm2336_vm8 = vcmp.lt.s32.totalorder %v2335_v13, 0  ;;  %v588_v53 = vadd.s32 536870912, %v587_v46  ;;  %v3146_v55 = vsel %vm217_vm7, %v301_v19, %v277_v50 }
 0x152   :  { %v401_v60 = vcvt.s32.f32 %v394_v28  ;;  %v286_v0 = vsel %vm2336_vm8, 0, %v2335_v13  ;;  %v440_v4 = vshll.u32 %v2763_v31, %v437_v48  ;;  %v443_v2 = vshll.u32 %v2764_v33, %v437_v48 }
 0x153   :  { %v399_v57 = vand.u32 2147483647, %v398_v27  ;;  %v287_v61 = vsub.s32 32, %v286_v0  ;;  %v291_v63 = vsub.s32 4294967266, %v286_v0  ;;  %v3149_v1 = vshrl.u32 %v588_v53, 30 }
 0x154   :  { %v288_v7 = vshll.u32 %v3113_v6, %v286_v0  ;;  %v441_v10 = vshrl.u32 %v2764_v33, %v438_v54  ;;  %v444_v11 = vshrl.u32 %v2765_v36, %v438_v54  ;;  %vm321_vm9 = vcmp.lt.s32.totalorder %v2969_v56, 0 }
 0x155   :  { %v402_v5 = vmul.f32 %v401_v60, %v399_v57  ;;  %v289_v50 = vshrl.u32 %v271_v12, %v287_v61  ;;  %v292_v29 = vadd.s32 127, %v291_v63  ;;  %v590_v15 = vshll.u32 %v3149_v1, 30 }
 0x156   :  { %v447_v17 = vshrl.u32 %v2766_v38, %v438_v54  ;;  %v442_v25 = vor.u32 %v441_v10, %v440_v4  ;;  %v445_v23 = vor.u32 %v444_v11, %v443_v2  ;;  %v446_v30 = vshll.u32 %v2765_v36, %v437_v48 }
 0x157   :  { %vm455_vm10 = vcmp.lt.s32.totalorder %v3139_v49, 1  ;;  %v290_v32 = vor.u32 %v289_v50, %v288_v7  ;;  %v293_v6 = vshll.u32 %v292_v29, 23  ;;  %v3160_v14 = vsub.s32 %v587_v46, %v590_v15 }
 0x158   :  { %v449_v22 = vshll.u32 %v2766_v38, %v437_v48  ;;  %v448_v34 = vor.u32 %v447_v17, %v446_v30  ;;  %v450_v37 = vshrl.u32 %v2767_v40, %v438_v54  ;;  %v452_v39 = vshll.u32 %v2767_v40, %v437_v48 }
 0x159   :  { %v453_v41 = vshrl.u32 %v2768_v47, %v438_v54  ;;  %v403_v42 = vxor.u32 2147483648, %v402_v5  ;;  %v294_v43 = vor.u32 4788187, %v293_v6  ;;  %v593_v44 = vsub.s32 0, %v3160_v14 }
 0x15a   :  { %v439_v20 = vshrl.u32 %v2763_v31, %v438_v54  ;;  %v297_v16 = vcvt.s32.f32 %v290_v32  ;;  %v451_v19 = vor.u32 %v450_v37, %v449_v22  ;;  %vm457_vm11 = vcmp.lt.s32.totalorder %v3139_v49, 3 }
 0x15b   :  { %v454_v28 = vor.u32 %v453_v41, %v452_v39  ;;  %v295_v45 = vand.u32 2147483647, %v294_v43  ;;  %v2346_v21 = vmin.u32 %v593_v44, %v3160_v14  ;;  %vm458_vm12 = vcmp.lt.s32.totalorder %v3139_v49, 4 }
 0x15c   :  { %v463_v12 = vsel %vm455_vm10, %v442_v25, %v445_v23  ;;  %v460_v13 = vsel %vm458_vm12, %v448_v34, 2102212464  ;;  %v464_v46 = vsel %vm458_vm12, %v451_v19, 920167782  ;;  %v467_v48 = vsel %vm455_vm10, %v445_v23, %v448_v34 }
 0x15d   :  { %v468_v27 = vsel %vm458_vm12, %v454_v28, 1326507024  ;;  %v298_v53 = vmul.f32 %v297_v16, %v295_v45  ;;  %v595_v54 = vclz %v2346_v21  ;;  %vm456_vm13 = vcmp.lt.s32.totalorder %v3139_v49, 2 }
 0x15e   :  { %v465_v57 = vsel %vm457_vm11, %v448_v34, %v464_v46  ;;  %v404_v60 = vsel %vm321_vm9, %v403_v42, %v402_v5  ;;  %v459_v0 = vsel %vm455_vm10, %v439_v20, %v442_v25  ;;  %v469_v61 = vsel %vm457_vm11, %v451_v19, %v468_v27 }
 0x15f   :  { %v466_v4 = vsel %vm456_vm13, %v463_v12, %v465_v57  ;;  %v299_v63 = vxor.u32 2147483648, %v298_v53  ;;  %v2347_v2 = vadd.s32 4294967294, %v595_v54  ;;  %v461_v7 = vsel %vm457_vm11, %v445_v23, %v460_v13 }
 0x160   :  { %v470_v10 = vsel %vm456_vm13, %v467_v48, %v469_v61  ;;  %v3195_v50 = vmul.u32.u64.low %v3141_v51, %v466_v4  ;;  %v3196_v29 = vmul.u32.u64.high %v3141_v51, %v466_v4, %v3195_v50  ;;  %vm3203_vm0 = vcmp.le.f32.partialorder %v215_v62, 0.7853982 }
 0x161   :  { %v3191_v11 = vmul.u32.u64.low %v3141_v51, %v470_v10  ;;  %v3192_v5 = vmul.u32.u64.high %v3141_v51, %v470_v10, %v3191_v11  ;;  %v300_v15 = vsel %vm217_vm7, %v299_v63, %v298_v53  ;;  %vm2348_vm15 = vcmp.lt.s32.totalorder %v2347_v2, 0 }
 0x162   :  { %v598_v25 = vsel %vm2348_vm15, 0, %v2347_v2  ;;  %v462_v23 = vsel %vm456_vm13, %v459_v0, %v461_v7  ;;  %v303_v30 = vsel %vm3203_vm0, %v2971_v58, %v300_v15  ;;  %vm3214_vm1 = vcmp.le.f32.partialorder %v319_v59, 0.7853982 }
 0x163   :  { %v603_v6 = vsub.s32 4294967266, %v598_v25  ;;  %v304_v62 = vsel %vm3203_vm0, 0, %v3146_v55  ;;  %2698 = vcosq.f32 %v303_v30  ;;  %v407_v49 = vsel %vm3214_vm1, %v2969_v56, %v404_v60 }
 0x164   :  { %vm480_vm2 = vc.u32 %v3192_v5, %v3195_v50  ;;  %v481_v22 = vadd.s32 1, %v3196_v29  ;;  %2700 = vsinq.f32 %v303_v30  ;;  %v406_v59 = vsel %vm321_vm9, %v405_v52, %v3079_v26 }
 0x165   :  { %v599_v34 = vsub.s32 32, %v598_v25  ;;  %v604_v37 = vadd.s32 127, %v603_v6  ;;  %v478_v55 = vmul.u32 %v3141_v51, %v462_v23  ;;  %v583_v39 = vadd.s32 %v3117_v35, %v3124_v24 }
 0x166   :  { %v482_v41 = vsel %vm480_vm2, %v481_v22, %v3196_v29  ;;  %v308_v42 = vadd.s32 3, %v304_v62  ;;  %2702 = vcosq.f32 %v407_v49  ;;  %v408_v20 = vsel %vm3214_vm1, 0, %v406_v59 }
 0x167   :  { %v605_v43 = vshll.u32 %v604_v37, 23  ;;  %v483_v44 = vadd.s32 %v482_v41, %v478_v55  ;;  %2704 = vsinq.f32 %v407_v49  ;;  %v601_v16 = vshrl.u32 %v583_v39, %v599_v34 }
 0x168   :  { %v412_v26 = vadd.s32 3, %v408_v20  ;;  %v600_v52 = vshll.u32 %v3160_v14, %v598_v25  ;;  %v309_v45 = vand.u32 3, %v308_v42  ;;  %vm307_vm6 = vweird.f32 %v2971_v58 }
 0x169   :  { %v484_v19 = vadd.s32 536870912, %v483_v44  ;;  %v606_v28 = vor.u32 4788187, %v605_v43  ;;  %vm411_vm10 = vweird.f32 %v2969_v56  ;;  %vm529_vm12 = vcmp.lt.s32.totalorder %v2979_v3, 0 }
 0x16a   :  { %v602_v24 = vor.u32 %v601_v16, %v600_v52  ;;  %v413_v46 = vand.u32 3, %v412_v26  ;;  %vm314_vm3 = vcmp.eq.s32.totalorder %v309_v45, 2  ;;  %vm310_vm4 = vcmp.lt.s32.totalorder %v309_v45, 2 }
 0x16b   :  { %v3239_v51 = vshrl.u32 %v484_v19, 30  ;;  %v607_v48 = vand.u32 2147483647, %v606_v28  ;;  %vm311_vm5 = vcmp.eq.s32.totalorder %v309_v45, 0  ;;  %v479_v49 = vadd.s32 %v3195_v50, %v3192_v5 }
 0x16c   :  { %v609_v60 = vcvt.s32.f32 %v602_v24  ;;  %vm418_vm7 = vcmp.eq.s32.totalorder %v413_v46, 2  ;;  %vm415_vm8 = vcmp.eq.s32.totalorder %v413_v46, 0  ;;  %vm414_vm9 = vcmp.lt.s32.totalorder %v413_v46, 2 }
 0x16d   :  { %v2699_v35 = vpop.eup %2698  ;;  %v486_v21 = vshll.u32 %v3239_v51, 30  ;;  %vm3251_vm13 = vcmp.le.f32.partialorder %v527_v8, 0.7853982  ;;  %v613_v43 = vsub.s32 4, %v3149_v1  ;;  %v509_v16 = vsub.s32 4, %v3239_v51 }
 0x16e   :  { %v2701_v12 = vpop.eup %2700  ;;  %v315_v13 = vxor.u32 2147483648, %v2699_v35  ;;  %v610_v7 = vmul.f32 %v609_v60, %v607_v48  ;;  %vm425_vm15 = vcmp.lt.s32.totalorder %v2984_v9, 0  ;;  %vm424_vm0 = vcmp.le.f32.partialorder %v423_v18, 0.7853982 }
 0x16f   :  { %v487_v27 = vsub.s32 %v483_v44, %v486_v21  ;;  %v312_v53 = vxor.u32 2147483648, %v2701_v12  ;;  %v614_v8 = vsel %vm529_vm12, %v613_v43, %v3149_v1  ;;  %v510_v28 = vsel %vm425_vm15, %v509_v16, %v3239_v51 }
 0x170   :  { %v2703_v54 = vpop.eup %2702  ;;  %v316_v57 = vsel %vm314_vm3, %v315_v13, %v2701_v12  ;;  %v611_v30 = vxor.u32 2147483648, %v610_v7  ;;  %v616_v26 = vsel %vm3251_vm13, 0, %v614_v8  ;;  %v512_v21 = vsel %vm424_vm0, 0, %v510_v28 }
 0x171   :  { %v2705_v14 = vpop.eup %2704  ;;  %v489_v0 = vsub.s32 0, %v487_v27  ;;  %v313_v4 = vsel %vm311_vm5, %v2699_v35, %v312_v53  ;;  %v419_v61 = vxor.u32 2147483648, %v2703_v54  ;;  %v620_v35 = vadd.s32 3, %v616_v26 }
 0x172   :  { %v317_v63 = vsel %vm310_vm4, %v313_v4, %v316_v57  ;;  %v416_v2 = vxor.u32 2147483648, %v2705_v14  ;;  %v612_v62 = vsel %vm529_vm12, %v611_v30, %v610_v7  ;;  %v516_v13 = vadd.s32 3, %v512_v21 }
 0x173   :  { %v2342_v10 = vmin.u32 %v489_v0, %v487_v27  ;;  %v420_v11 = vsel %vm418_vm7, %v419_v61, %v2705_v14  ;;  %v318_v29 = vsel %vm307_vm6, nan, %v317_v63  ;;  %v615_v39 = vsel %vm3251_vm13, %v2979_v3, %v612_v62 }
 0x174   :  { %v417_v15 = vsel %vm415_vm8, %v2703_v54, %v416_v2  ;;  %2706 = vcosq.f32 %v615_v39  ;;  %v621_v12 = vand.u32 3, %v620_v35  ;;  %vm619_vm6 = vweird.f32 %v2979_v3  ;;  %v634_v3 = vld [vmem:[%s4164_s2 + $0x18] sm:$0xff] }
 0x175   :  { %v491_v17 = vclz %v2342_v10  ;;  %v421_v25 = vsel %vm414_vm9, %v417_v15, %v420_v11  ;;  %2708 = vsinq.f32 %v615_v39  ;;  %vm515_vm8 = vweird.f32 %v2984_v9  ;;  %v632_v10 = vld [vmem:[%s4164_s2 + $0x8] sm:$0xff]  ;;  %v633_v11 = vld [vmem:[%s4164_s2 + $0x10] sm:$0xff]  ;;  %v643_v15 = vpop.permute.xlu0 %642 }
 0x176   :  { %v422_v23 = vsel %vm411_vm10, nan, %v421_v25  ;;  %vm623_vm1 = vcmp.eq.s32.totalorder %v621_v12, 0  ;;  %vm626_vm2 = vcmp.eq.s32.totalorder %v621_v12, 2  ;;  %vm622_vm3 = vcmp.lt.s32.totalorder %v621_v12, 2 }
 0x177   :  { %v2343_v32 = vadd.s32 4294967294, %v491_v17  ;;  %v2601_v6 = vpack.c.bf16 %v422_v23, %v318_v29 }
 0x179   :  { %vm2344_vm11 = vcmp.lt.s32.totalorder %v2343_v32, 0  ;;  %2602 = vmatprep.subr.bf16.mxu1 %v2601_v6  ;;  %v653_v39 = vpop.permute.xlu0 %652 }
 0x17a   :  { %v494_v58 = vsel %vm2344_vm11, 0, %v2343_v32  ;;  %2604 = vmatpush3.bf16.msra.mxu1 %v2601_v6 }
 0x17b   :  { %v495_v22 = vsub.s32 32, %v494_v58  ;;  %v499_v59 = vsub.s32 4294967266, %v494_v58  ;;  %v496_v34 = vshll.u32 %v487_v27, %v494_v58  ;;  %v517_v27 = vand.u32 3, %v516_v13 }
 0x17d   :  { %v497_v37 = vshrl.u32 %v479_v49, %v495_v22  ;;  %v500_v55 = vadd.s32 127, %v499_v59  ;;  %vm522_vm4 = vcmp.eq.s32.totalorder %v517_v27, 2  ;;  %vm519_vm5 = vcmp.eq.s32.totalorder %v517_v27, 0 }
 0x17e   :  { %v2707_v24 = vpop.eup %2706  ;;  %vm518_vm7 = vcmp.lt.s32.totalorder %v517_v27, 2 }
 0x17f   :  { %v498_v41 = vor.u32 %v497_v37, %v496_v34  ;;  %v501_v42 = vshll.u32 %v500_v55, 23  ;;  %v2709_v1 = vpop.eup %2708  ;;  %v627_v48 = vxor.u32 2147483648, %v2707_v24 }
 0x180   :  { %v624_v46 = vxor.u32 2147483648, %v2709_v1 }
 0x181   :  { %v502_v5 = vor.u32 4788187, %v501_v42  ;;  %v505_v44 = vcvt.s32.f32 %v498_v41  ;;  %v628_v18 = vsel %vm626_vm2, %v627_v48, %v2709_v1 }
 0x182   :  { %v625_v53 = vsel %vm623_vm1, %v2707_v24, %v624_v46 }
 0x183   :  { %v503_v50 = vand.u32 2147483647, %v502_v5  ;;  %v629_v14 = vsel %vm622_vm3, %v625_v53, %v628_v18 }
 0x184   :  { %v630_v61 = vsel %vm619_vm6, nan, %v629_v14 }
 0x185   :  { %v506_v20 = vmul.f32 %v505_v44, %v503_v50 }
 0x187   :  { %v507_v19 = vxor.u32 2147483648, %v506_v20 }
 0x189   :  { %v508_v52 = vsel %vm425_vm15, %v507_v19, %v506_v20 }
 0x18a   :  { %v511_v45 = vsel %vm424_vm0, %v2984_v9, %v508_v52  ;;  %v648_v9 = vpop.permute.xlu1 %647  ;;  %v2373_v52 = vld [vmem:[%s4164_s2 + $0x20] sm:$0xff] }
 0x18b   :  { %2710 = vcosq.f32 %v511_v45 }
 0x18c   :  { %2712 = vsinq.f32 %v511_v45 }
 0x18e   :  { %v658_v6 = vpop.permute.xlu1 %657 }
 0x195   :  { %v2711_v54 = vpop.eup %2710 }
 0x196   :  { %v2713_v51 = vpop.eup %2712  ;;  %v523_v57 = vxor.u32 2147483648, %v2711_v54 }
 0x197   :  { %v520_v60 = vxor.u32 2147483648, %v2713_v51 }
 0x198   :  { %v524_v0 = vsel %vm522_vm4, %v523_v57, %v2713_v51 }
 0x199   :  { %v521_v4 = vsel %vm519_vm5, %v2711_v54, %v520_v60 }
 0x19a   :  { %v525_v63 = vsel %vm518_vm7, %v521_v4, %v524_v0 }
 0x19b   :  { %v526_v2 = vsel %vm515_vm8, nan, %v525_v63 }
 0x19c   :  { %v2605_v7 = vpack.c.bf16 %v630_v61, %v526_v2 }
 0x19e   :  { %2606 = vmatprep.subr.bf16.mxu1 %v2605_v7 }
 0x19f   :  { %2608 = vmatpush3.bf16.msra.mxu1 %v2605_v7 }
 0x1a2   :  { %2520 = vmatmul.mubr.msk.f32.vlgmr.msra.gmra.mrb[0].mxu1 %vm660_vm14, %v632_v10 }
 0x1a3   :  { %2522 = vmatprep.mubr.msk.f32.mxu1 %vm660_vm14, %v633_v11 }
 0x1a6   :  { %2523 = vmatmul.mubr.msk.f32.gmra.mrb[2].mxu1 %vm660_vm14, %v634_v3 }
 0x1a7   :  { %2533 = vmatprep.mubr.msk.f32.mxu1 %vm660_vm14, %v2373_v52 }
 0x275   :  { %v2521_v29 = vpop.f32.mrb[0].mxu1 }
 0x276   :  { %v3284_v17 = vadd.f32 %v2521_v29, %v648_v9  ;;  %v739_v25 = vpop.f32.mrb[1].mxu1 }
 0x277   :  { %v3286_v23 = vadd.f32 %v739_v25, %v643_v15 }
 0x278   :  { %v862_v30 = vand.u32 2147483647, %v3284_v17  ;;  %v865_v32 = vand.u32 2139095040, %v3284_v17 }
 0x279   :  { %v758_v58 = vand.u32 2147483647, %v3286_v23  ;;  %v761_v62 = vand.u32 2139095040, %v3286_v23  ;;  %v2524_v49 = vpop.f32.mrb[2].mxu1 }
 0x27a   :  { %v866_v22 = vshrl.u32 %v865_v32, 23  ;;  %v869_v59 = vand.u32 8388607, %v862_v30  ;;  %v3294_v56 = vadd.f32 %v2524_v49, %v658_v6  ;;  %v749_v34 = vpop.f32.mrb[3].mxu1 }
 0x27b   :  { %v762_v37 = vshrl.u32 %v761_v62, 23  ;;  %v765_v55 = vand.u32 8388607, %v758_v58  ;;  %v3300_v50 = vadd.f32 %v749_v34, %v653_v39 }
 0x27c   :  { %v2361_v41 = vadd.s32 4294967169, %v866_v22  ;;  %v1070_v42 = vand.u32 2147483647, %v3294_v56  ;;  %v1073_v5 = vand.u32 2139095040, %v3294_v56  ;;  %v870_v44 = vor.u32 8388608, %v869_v59 }
 0x27d   :  { %v2357_v43 = vadd.s32 4294967169, %v762_v37  ;;  %v766_v20 = vor.u32 8388608, %v765_v55  ;;  %v966_v35 = vand.u32 2147483647, %v3300_v50 }
 0x27e   :  { %v872_v8 = vadd.s32 1, %v2361_v41  ;;  %v1074_v19 = vshrl.u32 %v1073_v5, 23  ;;  %v3304_v26 = vand.u32 8388607, %v1070_v42  ;;  %v3311_v21 = vshll.u32 %v870_v44, 8 }
 0x27f   :  { %v768_v16 = vadd.s32 1, %v2357_v43  ;;  %v3315_v48 = vshll.u32 %v766_v20, 8 }
 0x280   :  { %vm873_vm9 = vcmp.gt.s32.totalorder %v872_v8, 0  ;;  %v2369_v45 = vadd.s32 4294967169, %v1074_v19  ;;  %v1078_v27 = vor.u32 8388608, %v3304_v26 }
 0x281   :  { %v874_v28 = vsel %vm873_vm9, %v872_v8, 0  ;;  %vm769_vm10 = vcmp.gt.s32.totalorder %v768_v16, 0 }
 0x282   :  { %v875_v24 = vshrl.u32 %v874_v28, 5  ;;  %v876_v1 = vand.u32 31, %v874_v28  ;;  %v770_v12 = vsel %vm769_vm10, %v768_v16, 0  ;;  %v3320_v51 = vadd.s32 1, %v2369_v45 }
 0x283   :  { %v3313_v13 = vshrl.u32 %v770_v12, 5  ;;  %v772_v46 = vand.u32 31, %v770_v12 }
 0x284   :  { %v877_v53 = vsub.s32 32, %v876_v1  ;;  %v879_v18 = vshll.u32 %v2763_v31, %v876_v1  ;;  %v882_v54 = vshll.u32 %v2764_v33, %v876_v1  ;;  %v885_v57 = vshll.u32 %v2765_v36, %v876_v1 }
 0x285   :  { %v888_v14 = vshll.u32 %v2766_v38, %v876_v1  ;;  %v891_v60 = vshll.u32 %v2767_v40, %v876_v1  ;;  %vm894_vm11 = vcmp.lt.s32.totalorder %v875_v24, 1  ;;  %vm895_vm12 = vcmp.lt.s32.totalorder %v875_v24, 2 }
 0x286   :  { %v880_v0 = vshrl.u32 %v2764_v33, %v877_v53  ;;  %v883_v4 = vshrl.u32 %v2765_v36, %v877_v53  ;;  %v886_v61 = vshrl.u32 %v2766_v38, %v877_v53  ;;  %v878_v63 = vshrl.u32 %v2763_v31, %v877_v53 }
 0x287   :  { %v889_v2 = vshrl.u32 %v2767_v40, %v877_v53  ;;  %v892_v7 = vshrl.u32 %v2768_v47, %v877_v53  ;;  %vm896_vm13 = vcmp.lt.s32.totalorder %v875_v24, 3  ;;  %v773_v9 = vsub.s32 32, %v772_v46 }
 0x288   :  { %v881_v10 = vor.u32 %v880_v0, %v879_v18  ;;  %v884_v11 = vor.u32 %v883_v4, %v882_v54  ;;  %v887_v3 = vor.u32 %v886_v61, %v885_v57  ;;  %vm897_vm15 = vcmp.lt.s32.totalorder %v875_v24, 4 }
 0x289   :  { %v890_v29 = vor.u32 %v889_v2, %v888_v14  ;;  %v893_v15 = vor.u32 %v892_v7, %v891_v60  ;;  %v775_v25 = vshll.u32 %v2763_v31, %v772_v46  ;;  %v778_v37 = vshll.u32 %v2764_v33, %v772_v46 }
 0x28a   :  { %v898_v32 = vsel %vm894_vm11, %v878_v63, %v881_v10  ;;  %v899_v6 = vsel %vm897_vm15, %v887_v3, 2102212464  ;;  %v902_v62 = vsel %vm894_vm11, %v881_v10, %v884_v11  ;;  %v906_v49 = vsel %vm894_vm11, %v884_v11, %v887_v3 }
 0x28b   :  { %v900_v22 = vsel %vm896_vm13, %v884_v11, %v899_v6  ;;  %v903_v59 = vsel %vm897_vm15, %v890_v29, 920167782  ;;  %v907_v34 = vsel %vm897_vm15, %v893_v15, 1326507024  ;;  %v774_v41 = vshrl.u32 %v2763_v31, %v773_v9 }
 0x28c   :  { %v904_v55 = vsel %vm896_vm13, %v887_v3, %v903_v59  ;;  %v908_v39 = vsel %vm896_vm13, %v890_v29, %v907_v34  ;;  %v776_v43 = vshrl.u32 %v2764_v33, %v773_v9  ;;  %v901_v5 = vsel %vm895_vm12, %v898_v32, %v900_v22 }
 0x28d   :  { %v905_v44 = vsel %vm895_vm12, %v902_v62, %v904_v55  ;;  %v909_v8 = vsel %vm895_vm12, %v906_v49, %v908_v39  ;;  %v779_v20 = vshrl.u32 %v2765_v36, %v773_v9  ;;  %v781_v12 = vshll.u32 %v2765_v36, %v772_v46 }
 0x28e   :  { %v3346_v16 = vmul.u32.u64.low %v3311_v21, %v909_v8  ;;  %v3347_v19 = vmul.u32.u64.high %v3311_v21, %v909_v8, %v3346_v16  ;;  %v3350_v52 = vmul.u32.u64.low %v3311_v21, %v905_v44  ;;  %v3351_v28 = vmul.u32.u64.high %v3311_v21, %v905_v44, %v3350_v52 }
 0x28f   :  { %v777_v45 = vor.u32 %v776_v43, %v775_v25  ;;  %v780_v1 = vor.u32 %v779_v20, %v778_v37  ;;  %v782_v53 = vshrl.u32 %v2766_v38, %v773_v9  ;;  %v917_v18 = vmul.u32 %v3311_v21, %v901_v5 }
 0x290   :  { %v784_v24 = vshll.u32 %v2766_v38, %v772_v46  ;;  %v785_v54 = vshrl.u32 %v2767_v40, %v773_v9  ;;  %v788_v57 = vshrl.u32 %v2768_v47, %v773_v9  ;;  %v787_v60 = vshll.u32 %v2767_v40, %v772_v46 }
 0x291   :  { %v783_v14 = vor.u32 %v782_v53, %v781_v12  ;;  %vm790_vm0 = vcmp.lt.s32.totalorder %v3313_v13, 1  ;;  %vm791_vm1 = vcmp.lt.s32.totalorder %v3313_v13, 2  ;;  %vm919_vm2 = vc.u32 %v3347_v19, %v3350_v52 }
 0x292   :  { %v920_v0 = vadd.s32 1, %v3351_v28  ;;  %v786_v4 = vor.u32 %v785_v54, %v784_v24  ;;  %vm792_vm3 = vcmp.lt.s32.totalorder %v3313_v13, 3  ;;  %v789_v21 = vor.u32 %v788_v57, %v787_v60 }
 0x293   :  { %vm793_vm4 = vcmp.lt.s32.totalorder %v3313_v13, 4  ;;  %v794_v61 = vsel %vm790_vm0, %v774_v41, %v777_v45  ;;  %v798_v63 = vsel %vm790_vm0, %v777_v45, %v780_v1  ;;  %v802_v10 = vsel %vm790_vm0, %v780_v1, %v783_v14 }
 0x294   :  { %v921_v2 = vsel %vm919_vm2, %v920_v0, %v3351_v28  ;;  %v795_v7 = vsel %vm793_vm4, %v783_v14, 2102212464  ;;  %v799_v46 = vsel %vm793_vm4, %v786_v4, 920167782  ;;  %v803_v29 = vsel %vm793_vm4, %v789_v21, 1326507024 }
 0x295   :  { %v922_v11 = vadd.s32 %v921_v2, %v917_v18  ;;  %v796_v3 = vsel %vm792_vm3, %v780_v1, %v795_v7  ;;  %v800_v9 = vsel %vm792_vm3, %v783_v14, %v799_v46  ;;  %v804_v25 = vsel %vm792_vm3, %v786_v4, %v803_v29 }
 0x296   :  { %v801_v15 = vsel %vm791_vm1, %v798_v63, %v800_v9  ;;  %vm1081_vm5 = vcmp.gt.s32.totalorder %v3320_v51, 0  ;;  %v969_v32 = vand.u32 2139095040, %v3300_v50  ;;  %v805_v62 = vsel %vm791_vm1, %v802_v10, %v804_v25 }
 0x297   :  { %v923_v6 = vadd.s32 536870912, %v922_v11  ;;  %v3374_v49 = vmul.u32.u64.low %v3315_v48, %v801_v15  ;;  %v3375_v22 = vmul.u32.u64.high %v3315_v48, %v801_v15, %v3374_v49  ;;  %v797_v59 = vsel %vm791_vm1, %v794_v61, %v796_v3 }
 0x298   :  { %v3381_v34 = vmul.u32.u64.low %v3315_v48, %v805_v62  ;;  %v3382_v37 = vmul.u32.u64.high %v3315_v48, %v805_v62, %v3381_v34  ;;  %v1082_v55 = vsel %vm1081_vm5, %v3320_v51, 0  ;;  %v3388_v43 = vadd.s32 %v3350_v52, %v3347_v19 }
 0x299   :  { %v3385_v39 = vshrl.u32 %v923_v6, 30  ;;  %v1084_v41 = vand.u32 31, %v1082_v55  ;;  %v3392_v5 = vshll.u32 %v1078_v27, 8  ;;  %v970_v44 = vshrl.u32 %v969_v32, 23 }
 0x29a   :  { %v3396_v13 = vand.u32 8388607, %v966_v35  ;;  %v813_v20 = vmul.u32 %v3315_v48, %v797_v59  ;;  %v816_v51 = vadd.s32 1, %v3375_v22  ;;  %vm815_vm6 = vc.u32 %v3382_v37, %v3374_v49 }
 0x29b   :  { %v925_v8 = vshll.u32 %v3385_v39, 30  ;;  %v1085_v16 = vsub.s32 32, %v1084_v41  ;;  %v1083_v19 = vshrl.u32 %v1082_v55, 5  ;;  %v1087_v26 = vshll.u32 %v2763_v31, %v1084_v41 }
 0x29c   :  { %v1090_v27 = vshll.u32 %v2764_v33, %v1084_v41  ;;  %v817_v28 = vsel %vm815_vm6, %v816_v51, %v3375_v22  ;;  %v1093_v1 = vshll.u32 %v2765_v36, %v1084_v41  ;;  %v1096_v18 = vshll.u32 %v2766_v38, %v1084_v41 }
 0x29d   :  { %v3405_v52 = vsub.s32 %v922_v11, %v925_v8  ;;  %v1088_v45 = vshrl.u32 %v2764_v33, %v1085_v16  ;;  %v818_v48 = vadd.s32 %v817_v28, %v813_v20  ;;  %v1091_v12 = vshrl.u32 %v2765_v36, %v1085_v16 }
 0x29e   :  { %v1094_v53 = vshrl.u32 %v2766_v38, %v1085_v16  ;;  %v1097_v57 = vshrl.u32 %v2767_v40, %v1085_v16  ;;  %v1099_v14 = vshll.u32 %v2767_v40, %v1084_v41  ;;  %v1100_v21 = vshrl.u32 %v2768_v47, %v1085_v16 }
 0x29f   :  { %v928_v24 = vsub.s32 0, %v3405_v52  ;;  %v1089_v54 = vor.u32 %v1088_v45, %v1087_v26  ;;  %v819_v60 = vadd.s32 536870912, %v818_v48  ;;  %v1092_v0 = vor.u32 %v1091_v12, %v1090_v27 }
 0x2a0   :  { %v1095_v4 = vor.u32 %v1094_v53, %v1093_v1  ;;  %v1086_v63 = vshrl.u32 %v2763_v31, %v1085_v16  ;;  %v1098_v2 = vor.u32 %v1097_v57, %v1096_v18  ;;  %v2365_v7 = vadd.s32 4294967169, %v970_v44 }
 0x2a1   :  { %v2362_v61 = vmin.u32 %v928_v24, %v3405_v52  ;;  %v3419_v46 = vshrl.u32 %v819_v60, 30  ;;  %v1101_v10 = vor.u32 %v1100_v21, %v1099_v14  ;;  %vm1102_vm7 = vcmp.lt.s32.totalorder %v1083_v19, 1 }
 0x2a2   :  { %vm1105_vm8 = vcmp.lt.s32.totalorder %v1083_v19, 4  ;;  %vm1103_vm9 = vcmp.lt.s32.totalorder %v1083_v19, 2  ;;  %v1110_v9 = vsel %vm1102_vm7, %v1089_v54, %v1092_v0  ;;  %vm1104_vm10 = vcmp.lt.s32.totalorder %v1083_v19, 3 }
 0x2a3   :  { %v930_v11 = vclz %v2362_v61  ;;  %v1107_v3 = vsel %vm1105_vm8, %v1095_v4, 2102212464  ;;  %v821_v29 = vshll.u32 %v3419_v46, 30  ;;  %v1111_v15 = vsel %vm1105_vm8, %v1098_v2, 920167782 }
 0x2a4   :  { %v1114_v25 = vsel %vm1102_vm7, %v1092_v0, %v1095_v4  ;;  %v1106_v6 = vsel %vm1102_vm7, %v1086_v63, %v1089_v54  ;;  %v1112_v62 = vsel %vm1104_vm10, %v1095_v4, %v1111_v15  ;;  %v1115_v22 = vsel %vm1105_vm8, %v1101_v10, 1326507024 }
 0x2a5   :  { %v2363_v32 = vadd.s32 4294967294, %v930_v11  ;;  %v3422_v59 = vsub.s32 %v818_v48, %v821_v29  ;;  %v1108_v34 = vsel %vm1104_vm10, %v1092_v0, %v1107_v3  ;;  %v1113_v55 = vsel %vm1103_vm9, %v1110_v9, %v1112_v62 }
 0x2a6   :  { %v1116_v41 = vsel %vm1104_vm10, %v1098_v2, %v1115_v22  ;;  %v3427_v8 = vmul.u32.u64.low %v3392_v5, %v1113_v55  ;;  %v3428_v20 = vmul.u32.u64.high %v3392_v5, %v1113_v55, %v3427_v8  ;;  %v1109_v1 = vsel %vm1103_vm9, %v1106_v6, %v1108_v34 }
 0x2a7   :  { %vm2364_vm11 = vcmp.lt.s32.totalorder %v2363_v32, 0  ;;  %v1117_v44 = vsel %vm1103_vm9, %v1114_v25, %v1116_v41  ;;  %v824_v16 = vsub.s32 0, %v3422_v59  ;;  %v976_v48 = vadd.s32 1, %v2365_v7 }
 0x2a8   :  { %v933_v51 = vsel %vm2364_vm11, 0, %v2363_v32  ;;  %v3433_v26 = vmul.u32.u64.low %v3392_v5, %v1117_v44  ;;  %v3434_v27 = vmul.u32.u64.high %v3392_v5, %v1117_v44, %v3433_v26  ;;  %v974_v18 = vor.u32 8388608, %v3396_v13 }
 0x2a9   :  { %v934_v28 = vsub.s32 32, %v933_v51  ;;  %v938_v45 = vsub.s32 4294967266, %v933_v51  ;;  %v935_v12 = vshll.u32 %v3405_v52, %v933_v51  ;;  %v2358_v53 = vmin.u32 %v824_v16, %v3422_v59 }
 0x2aa   :  { %v1128_v57 = vadd.s32 1, %v3428_v20  ;;  %vm977_vm12 = vcmp.gt.s32.totalorder %v976_v48, 0  ;;  %v1125_v60 = vmul.u32 %v3392_v5, %v1109_v1  ;;  %vm1127_vm13 = vc.u32 %v3434_v27, %v3427_v8 }
 0x2ab   :  { %v936_v24 = vshrl.u32 %v3388_v43, %v934_v28  ;;  %v939_v54 = vadd.s32 127, %v938_v45  ;;  %v826_v14 = vclz %v2358_v53  ;;  %v978_v19 = vsel %vm977_vm12, %v976_v48, 0 }
 0x2ac   :  { %v814_v52 = vadd.s32 %v3374_v49, %v3382_v37  ;;  %v1129_v13 = vsel %vm1127_vm13, %v1128_v57, %v3428_v20  ;;  %vm864_vm15 = vcmp.lt.s32.totalorder %v3284_v17, 0  ;;  %v3449_v61 = vshrl.u32 %v978_v19, 5 }
 0x2ad   :  { %v937_v0 = vor.u32 %v936_v24, %v935_v12  ;;  %v940_v4 = vshll.u32 %v939_v54, 23  ;;  %v2359_v43 = vadd.s32 4294967294, %v826_v14  ;;  %v1130_v21 = vadd.s32 %v1129_v13, %v1125_v60 }
 0x2ae   :  { %v980_v63 = vand.u32 31, %v978_v19  ;;  %vm3453_vm0 = vcmp.le.f32.partialorder %v862_v30, 0.7853982  ;;  %v3457_v7 = vshll.u32 %v974_v18, 8  ;;  %v844_v49 = vsub.s32 4, %v3419_v46 }
 0x2af   :  { %v941_v2 = vor.u32 4788187, %v940_v4  ;;  %v948_v37 = vsub.s32 4, %v3385_v39  ;;  %v944_v10 = vcvt.s32.f32 %v937_v0  ;;  %vm2360_vm1 = vcmp.lt.s32.totalorder %v2359_v43, 0 }
 0x2b0   :  { %v1131_v11 = vadd.s32 536870912, %v1130_v21  ;;  %v981_v3 = vsub.s32 32, %v980_v63  ;;  %v829_v29 = vsel %vm2360_vm1, 0, %v2359_v43  ;;  %v983_v15 = vshll.u32 %v2763_v31, %v980_v63 }
 0x2b1   :  { %v942_v9 = vand.u32 2147483647, %v941_v2  ;;  %v986_v30 = vshll.u32 %v2764_v33, %v980_v63  ;;  %v830_v25 = vsub.s32 32, %v829_v29  ;;  %v834_v32 = vsub.s32 4294967266, %v829_v29 }
 0x2b2   :  { %v3463_v6 = vshrl.u32 %v1131_v11, 30  ;;  %v989_v62 = vshll.u32 %v2765_v36, %v980_v63  ;;  %vm998_vm2 = vcmp.lt.s32.totalorder %v3449_v61, 1  ;;  %v831_v34 = vshll.u32 %v3422_v59, %v829_v29 }
 0x2b3   :  { %v945_v22 = vmul.f32 %v944_v10, %v942_v9  ;;  %v984_v55 = vshrl.u32 %v2764_v33, %v981_v3  ;;  %v987_v41 = vshrl.u32 %v2765_v36, %v981_v3  ;;  %v832_v44 = vshrl.u32 %v814_v52, %v830_v25 }
 0x2b4   :  { %v835_v20 = vadd.s32 127, %v834_v32  ;;  %v1133_v51 = vshll.u32 %v3463_v6, 30  ;;  %v990_v16 = vshrl.u32 %v2766_v38, %v981_v3  ;;  %v992_v1 = vshll.u32 %v2766_v38, %v980_v63 }
 0x2b5   :  { %v946_v26 = vxor.u32 2147483648, %v945_v22  ;;  %v985_v28 = vor.u32 %v984_v55, %v983_v15  ;;  %v988_v45 = vor.u32 %v987_v41, %v986_v30  ;;  %vm760_vm3 = vcmp.lt.s32.totalorder %v3286_v23, 0 }
 0x2b6   :  { %v833_v48 = vor.u32 %v832_v44, %v831_v34  ;;  %v836_v12 = vshll.u32 %v835_v20, 23  ;;  %v3474_v59 = vsub.s32 %v1130_v21, %v1133_v51  ;;  %v991_v53 = vor.u32 %v990_v16, %v989_v62 }
 0x2b7   :  { %v947_v18 = vsel %vm864_vm15, %v946_v26, %v945_v22  ;;  %v993_v24 = vshrl.u32 %v2767_v40, %v981_v3  ;;  %v995_v54 = vshll.u32 %v2767_v40, %v980_v63  ;;  %v996_v57 = vshrl.u32 %v2768_v47, %v981_v3 }
 0x2b8   :  { %v950_v14 = vsel %vm3453_vm0, %v3284_v17, %v947_v18  ;;  %vm3486_vm4 = vcmp.le.f32.partialorder %v758_v58, 0.7853982  ;;  %v837_v19 = vor.u32 4788187, %v836_v12  ;;  %v1136_v0 = vsub.s32 0, %v3474_v59 }
 0x2b9   :  { %v982_v4 = vshrl.u32 %v2763_v31, %v981_v3  ;;  %2714 = vcosq.f32 %v950_v14  ;;  %v840_v52 = vcvt.s32.f32 %v833_v48  ;;  %v994_v13 = vor.u32 %v993_v24, %v992_v1 }
 0x2ba   :  { %v997_v43 = vor.u32 %v996_v57, %v995_v54  ;;  %2716 = vsinq.f32 %v950_v14  ;;  %v838_v21 = vand.u32 2147483647, %v837_v19  ;;  %v2370_v63 = vmin.u32 %v1136_v0, %v3474_v59 }
 0x2bb   :  { %vm1001_vm5 = vcmp.lt.s32.totalorder %v3449_v61, 4  ;;  %vm1000_vm6 = vcmp.lt.s32.totalorder %v3449_v61, 3  ;;  %v1006_v2 = vsel %vm998_vm2, %v985_v28, %v988_v45  ;;  %vm999_vm7 = vcmp.lt.s32.totalorder %v3449_v61, 2 }
 0x2bc   :  { %v1003_v58 = vsel %vm1001_vm5, %v991_v53, 2102212464  ;;  %v1007_v10 = vsel %vm1001_vm5, %v994_v13, 920167782  ;;  %v841_v11 = vmul.f32 %v840_v52, %v838_v21  ;;  %v1138_v9 = vclz %v2370_v63 }
 0x2bd   :  { %v1008_v3 = vsel %vm1000_vm6, %v991_v53, %v1007_v10  ;;  %v1002_v29 = vsel %vm998_vm2, %v982_v4, %v985_v28  ;;  %v1010_v30 = vsel %vm998_vm2, %v988_v45, %v991_v53  ;;  %v1011_v25 = vsel %vm1001_vm5, %v997_v43, 1326507024 }
 0x2be   :  { %v1009_v15 = vsel %vm999_vm7, %v1006_v2, %v1008_v3  ;;  %v842_v32 = vxor.u32 2147483648, %v841_v11  ;;  %v2371_v62 = vadd.s32 4294967294, %v1138_v9  ;;  %v1004_v22 = vsel %vm1000_vm6, %v988_v45, %v1003_v58 }
 0x2bf   :  { %v1012_v34 = vsel %vm1000_vm6, %v994_v13, %v1011_v25  ;;  %v3507_v41 = vmul.u32.u64.low %v3457_v7, %v1009_v15  ;;  %v3508_v44 = vmul.u32.u64.high %v3457_v7, %v1009_v15, %v3507_v41  ;;  %v845_v20 = vsel %vm760_vm3, %v844_v49, %v3419_v46 }
 0x2c0   :  { %v1013_v55 = vsel %vm999_vm7, %v1010_v30, %v1012_v34  ;;  %v843_v51 = vsel %vm760_vm3, %v842_v32, %v841_v11  ;;  %vm2372_vm8 = vcmp.lt.s32.totalorder %v2371_v62, 0  ;;  %v1005_v1 = vsel %vm999_vm7, %v1002_v29, %v1004_v22 }
 0x2c1   :  { %v3519_v16 = vmul.u32.u64.low %v3457_v7, %v1013_v55  ;;  %v3520_v26 = vmul.u32.u64.high %v3457_v7, %v1013_v55, %v3519_v16  ;;  %v846_v28 = vsel %vm3486_vm4, %v3286_v23, %v843_v51  ;;  %v1141_v45 = vsel %vm2372_vm8, 0, %v2371_v62 }
 0x2c2   :  { %v949_v46 = vsel %vm864_vm15, %v948_v37, %v3385_v39  ;;  %2718 = vcosq.f32 %v846_v28  ;;  %v1146_v49 = vsub.s32 4294967266, %v1141_v45  ;;  %v847_v48 = vsel %vm3486_vm4, 0, %v845_v20 }
 0x2c3   :  { %v2715_v12 = vpop.eup %2714  ;;  %2720 = vsinq.f32 %v846_v28  ;;  %v1024_v53 = vadd.s32 1, %v3508_v44  ;;  %v951_v18 = vsel %vm3453_vm0, 0, %v949_v46  ;;  %v1142_v24 = vsub.s32 32, %v1141_v45 }
 0x2c4   :  { %v2717_v61 = vpop.eup %2716  ;;  %v1147_v54 = vadd.s32 127, %v1146_v49  ;;  %v1021_v57 = vmul.u32 %v3457_v7, %v1005_v1  ;;  %vm1023_vm9 = vc.u32 %v3520_v26, %v3507_v41  ;;  %v851_v37 = vadd.s32 3, %v847_v48 }
 0x2c5   :  { %v1025_v39 = vsel %vm1023_vm9, %v1024_v53, %v3508_v44  ;;  %v1126_v14 = vadd.s32 %v3427_v8, %v3434_v27  ;;  %v955_v0 = vadd.s32 3, %v951_v18  ;;  %v959_v4 = vxor.u32 2147483648, %v2717_v61 }
 0x2c6   :  { %v1148_v60 = vshll.u32 %v1147_v54, 23  ;;  %v1026_v19 = vadd.s32 %v1025_v39, %v1021_v57  ;;  %v962_v43 = vxor.u32 2147483648, %v2715_v12  ;;  %v852_v21 = vand.u32 3, %v851_v37 }
 0x2c7   :  { %v1144_v5 = vshrl.u32 %v1126_v14, %v1142_v24  ;;  %v956_v13 = vand.u32 3, %v955_v0  ;;  %v1143_v7 = vshll.u32 %v3474_v59, %v1141_v45  ;;  %vm954_vm15 = vweird.f32 %v3284_v17 }
 0x2c8   :  { %v1027_v52 = vadd.s32 536870912, %v1026_v19  ;;  %v1149_v63 = vor.u32 4788187, %v1148_v60  ;;  %vm857_vm13 = vcmp.eq.s32.totalorder %v852_v21, 2  ;;  %vm854_vm0 = vcmp.eq.s32.totalorder %v852_v21, 0 }
 0x2c9   :  { %vm958_vm10 = vcmp.eq.s32.totalorder %v956_v13, 0  ;;  %vm961_vm11 = vcmp.eq.s32.totalorder %v956_v13, 2  ;;  %v1145_v11 = vor.u32 %v1144_v5, %v1143_v7  ;;  %vm957_vm12 = vcmp.lt.s32.totalorder %v956_v13, 2 }
 0x2ca   :  { %v3544_v58 = vshrl.u32 %v1027_v52, 30  ;;  %v960_v2 = vsel %vm958_vm10, %v2715_v12, %v959_v4  ;;  %v963_v27 = vsel %vm961_vm11, %v962_v43, %v2717_v61  ;;  %v1150_v15 = vand.u32 2147483647, %v1149_v63 }
 0x2cb   :  { %v964_v29 = vsel %vm957_vm12, %v960_v2, %v963_v27  ;;  %v1152_v62 = vcvt.s32.f32 %v1145_v11  ;;  %vm853_vm1 = vcmp.lt.s32.totalorder %v852_v21, 2  ;;  %vm850_vm2 = vweird.f32 %v3286_v23 }
 0x2cc   :  { %v2719_v10 = vpop.eup %2718  ;;  %v1029_v8 = vshll.u32 %v3544_v58, 30  ;;  %v965_v25 = vsel %vm954_vm15, nan, %v964_v29  ;;  %vm1072_vm4 = vcmp.lt.s32.totalorder %v3294_v56, 0  ;;  %v1022_v23 = vadd.s32 %v3507_v41, %v3520_v26 }
 0x2cd   :  { %v2721_v9 = vpop.eup %2720  ;;  %v858_v3 = vxor.u32 2147483648, %v2719_v10  ;;  %v1153_v44 = vmul.f32 %v1152_v62, %v1150_v15  ;;  %vm3556_vm5 = vcmp.le.f32.partialorder %v1070_v42, 0.7853982  ;;  %v1156_v39 = vsub.s32 4, %v3463_v6 }
 0x2ce   :  { %v1030_v59 = vsub.s32 %v1026_v19, %v1029_v8  ;;  %v855_v30 = vxor.u32 2147483648, %v2721_v9  ;;  %v1052_v60 = vsub.s32 4, %v3544_v58  ;;  %vm968_vm6 = vcmp.lt.s32.totalorder %v3300_v50, 0 }
 0x2cf   :  { %v859_v32 = vsel %vm857_vm13, %v858_v3, %v2721_v9  ;;  %v1154_v17 = vxor.u32 2147483648, %v1153_v44  ;;  %v1157_v42 = vsel %vm1072_vm4, %v1156_v39, %v3463_v6  ;;  %vm967_vm7 = vcmp.le.f32.partialorder %v966_v35, 0.7853982 }
 0x2d0   :  { %v1032_v22 = vsub.s32 0, %v1030_v59  ;;  %v856_v34 = vsel %vm854_vm0, %v2719_v10, %v855_v30  ;;  %v1159_v0 = vsel %vm3556_vm5, 0, %v1157_v42  ;;  %v1053_v5 = vsel %vm968_vm6, %v1052_v60, %v3544_v58 }
 0x2d1   :  { %v860_v55 = vsel %vm853_vm1, %v856_v34, %v859_v32  ;;  %v1155_v46 = vsel %vm1072_vm4, %v1154_v17, %v1153_v44  ;;  %v1163_v13 = vadd.s32 3, %v1159_v0  ;;  %v1055_v21 = vsel %vm967_vm7, 0, %v1053_v5  ;;  %v2375_v34 = vld [vmem:[%s4164_s2 + $0x30] sm:$0xff]  ;;  %v1187_v44 = vpop.permute.xlu0 %1186 }
 0x2d2   :  { %v2366_v20 = vmin.u32 %v1032_v22, %v1030_v59  ;;  %v861_v51 = vsel %vm850_vm2, nan, %v860_v55  ;;  %v1158_v24 = vsel %vm3556_vm5, %v3294_v56, %v1155_v46  ;;  %v1059_v63 = vadd.s32 3, %v1055_v21  ;;  %v2374_v22 = vld [vmem:[%s4164_s2 + $0x28] sm:$0xff] }
 0x2d3   :  { %v2609_v16 = vpack.c.bf16 %v965_v25, %v861_v51  ;;  %2722 = vcosq.f32 %v1158_v24  ;;  %v1164_v7 = vand.u32 3, %v1163_v13  ;;  %vm1162_vm13 = vweird.f32 %v3294_v56  ;;  %v2376_v56 = vld [vmem:[%s4164_s2 + $0x38] sm:$0xff] }
 0x2d4   :  { %v1034_v28 = vclz %v2366_v20  ;;  %2724 = vsinq.f32 %v1158_v24  ;;  %v1060_v11 = vand.u32 3, %v1059_v63  ;;  %vm1058_vm0 = vweird.f32 %v3300_v50 }
 0x2d5   :  { %2610 = vmatprep.subr.bf16.mxu1 %v2609_v16  ;;  %vm1166_vm8 = vcmp.eq.s32.totalorder %v1164_v7, 0  ;;  %vm1169_vm9 = vcmp.eq.s32.totalorder %v1164_v7, 2  ;;  %vm1165_vm10 = vcmp.lt.s32.totalorder %v1164_v7, 2  ;;  %v1197_v24 = vpop.permute.xlu0 %1196 }
 0x2d6   :  { %v2367_v45 = vadd.s32 4294967294, %v1034_v28  ;;  %2612 = vmatpush3.bf16.msra.mxu1 %v2609_v16  ;;  %vm1065_vm11 = vcmp.eq.s32.totalorder %v1060_v11, 2  ;;  %vm1062_vm12 = vcmp.eq.s32.totalorder %v1060_v11, 0  ;;  %vm1061_vm15 = vcmp.lt.s32.totalorder %v1060_v11, 2 }
 0x2d8   :  { %vm2368_vm3 = vcmp.lt.s32.totalorder %v2367_v45, 0 }
 0x2d9   :  { %v1037_v1 = vsel %vm2368_vm3, 0, %v2367_v45 }
 0x2da   :  { %v1038_v49 = vsub.s32 32, %v1037_v1  ;;  %v1042_v48 = vsub.s32 4294967266, %v1037_v1  ;;  %v1039_v53 = vshll.u32 %v1030_v59, %v1037_v1 }
 0x2dc   :  { %v1040_v18 = vshrl.u32 %v1022_v23, %v1038_v49  ;;  %v1043_v61 = vadd.s32 127, %v1042_v48 }
 0x2dd   :  { %v2723_v43 = vpop.eup %2722 }
 0x2de   :  { %v1041_v54 = vor.u32 %v1040_v18, %v1039_v53  ;;  %v1044_v57 = vshll.u32 %v1043_v61, 23  ;;  %v2725_v6 = vpop.eup %2724  ;;  %v1170_v10 = vxor.u32 2147483648, %v2723_v43 }
 0x2df   :  { %v1167_v2 = vxor.u32 2147483648, %v2725_v6 }
 0x2e0   :  { %v1045_v41 = vor.u32 4788187, %v1044_v57  ;;  %v1048_v37 = vcvt.s32.f32 %v1041_v54  ;;  %v1171_v35 = vsel %vm1169_vm9, %v1170_v10, %v2725_v6 }
 0x2e1   :  { %v1168_v8 = vsel %vm1166_vm8, %v2723_v43, %v1167_v2 }
 0x2e2   :  { %v1046_v26 = vand.u32 2147483647, %v1045_v41  ;;  %v1172_v3 = vsel %vm1165_vm10, %v1168_v8, %v1171_v35 }
 0x2e3   :  { %v1173_v30 = vsel %vm1162_vm13, nan, %v1172_v3 }
 0x2e4   :  { %v1049_v14 = vmul.f32 %v1048_v37, %v1046_v26 }
 0x2e6   :  { %v1050_v19 = vxor.u32 2147483648, %v1049_v14 }
 0x2e8   :  { %v1051_v4 = vsel %vm968_vm6, %v1050_v19, %v1049_v14 }
 0x2e9   :  { %v1054_v52 = vsel %vm967_vm7, %v3300_v50, %v1051_v4  ;;  %v1192_v50 = vpop.permute.xlu1 %1191  ;;  %v2401_v4 = vld [vmem:[%s4164_s2 + $0x40] sm:$0xff] }
 0x2ea   :  { %2726 = vcosq.f32 %v1054_v52 }
 0x2eb   :  { %2728 = vsinq.f32 %v1054_v52 }
 0x2ed   :  { %v1202_v45 = vpop.permute.xlu1 %1201 }
 0x2f4   :  { %v2727_v27 = vpop.eup %2726 }
 0x2f5   :  { %v2729_v58 = vpop.eup %2728  ;;  %v1066_v9 = vxor.u32 2147483648, %v2727_v27 }
 0x2f6   :  { %v1063_v29 = vxor.u32 2147483648, %v2729_v58 }
 0x2f7   :  { %v1067_v15 = vsel %vm1065_vm11, %v1066_v9, %v2729_v58 }
 0x2f8   :  { %v1064_v59 = vsel %vm1062_vm12, %v2727_v27, %v1063_v29 }
 0x2f9   :  { %v1068_v25 = vsel %vm1061_vm15, %v1064_v59, %v1067_v15 }
 0x2fa   :  { %v1069_v32 = vsel %vm1058_vm0, nan, %v1068_v25 }
 0x2fb   :  { %v2613_v62 = vpack.c.bf16 %v1173_v30, %v1069_v32 }
 0x2fd   :  { %2614 = vmatprep.subr.bf16.mxu1 %v2613_v62 }
 0x2fe   :  { %2616 = vmatpush3.bf16.msra.mxu1 %v2613_v62 }
 0x301   :  { %2534 = vmatmul.mubr.msk.f32.vlgmr.msra.gmra.mrb[4].mxu1 %vm660_vm14, %v2374_v22 }
 0x302   :  { %2536 = vmatprep.mubr.msk.f32.mxu1 %vm660_vm14, %v2375_v34 }
 0x305   :  { %2537 = vmatmul.mubr.msk.f32.gmra.mrb[6].mxu1 %vm660_vm14, %v2376_v56 }
 0x306   :  { %2547 = vmatprep.mubr.msk.f32.mxu1 %vm660_vm14, %v2401_v4 }
 0x3d4   :  { %v2535_v55 = vpop.f32.mrb[4].mxu1 }
 0x3d5   :  { %v3589_v20 = vadd.f32 %v2535_v55, %v1192_v50  ;;  %v1282_v51 = vpop.f32.mrb[5].mxu1 }
 0x3d6   :  { %v3591_v16 = vadd.f32 %v1282_v51, %v1187_v44 }
 0x3d7   :  { %v1405_v28 = vand.u32 2147483647, %v3589_v20  ;;  %v1408_v17 = vand.u32 2139095040, %v3589_v20 }
 0x3d8   :  { %v1301_v1 = vand.u32 2147483647, %v3591_v16  ;;  %v1304_v46 = vand.u32 2139095040, %v3591_v16  ;;  %v2538_v23 = vpop.f32.mrb[6].mxu1 }
 0x3d9   :  { %v1409_v49 = vshrl.u32 %v1408_v17, 23  ;;  %v1412_v48 = vand.u32 8388607, %v1405_v28  ;;  %v3599_v12 = vadd.f32 %v2538_v23, %v1202_v45  ;;  %v1292_v53 = vpop.f32.mrb[7].mxu1 }
 0x3da   :  { %v1305_v18 = vshrl.u32 %v1304_v46, 23  ;;  %v1308_v61 = vand.u32 8388607, %v1301_v1  ;;  %v3605_v26 = vadd.f32 %v1292_v53, %v1197_v24 }
 0x3db   :  { %v2389_v54 = vadd.s32 4294967169, %v1409_v49  ;;  %v1613_v57 = vand.u32 2147483647, %v3599_v12  ;;  %v1616_v41 = vand.u32 2139095040, %v3599_v12  ;;  %v1413_v37 = vor.u32 8388608, %v1412_v48 }
 0x3dc   :  { %v2385_v39 = vadd.s32 4294967169, %v1305_v18  ;;  %v1309_v14 = vor.u32 8388608, %v1308_v61  ;;  %v1509_v13 = vand.u32 2147483647, %v3605_v26 }
 0x3dd   :  { %v1415_v42 = vadd.s32 1, %v2389_v54  ;;  %v1617_v19 = vshrl.u32 %v1616_v41, 23  ;;  %v3609_v0 = vand.u32 8388607, %v1613_v57  ;;  %v3616_v21 = vshll.u32 %v1413_v37, 8 }
 0x3de   :  { %v1311_v60 = vadd.s32 1, %v2385_v39  ;;  %v3620_v10 = vshll.u32 %v1309_v14, 8 }
 0x3df   :  { %vm1416_vm1 = vcmp.gt.s32.totalorder %v1415_v42, 0  ;;  %v2397_v52 = vadd.s32 4294967169, %v1617_v19  ;;  %v1621_v11 = vor.u32 8388608, %v3609_v0 }
 0x3e0   :  { %v1417_v5 = vsel %vm1416_vm1, %v1415_v42, 0  ;;  %vm1312_vm2 = vcmp.gt.s32.totalorder %v1311_v60, 0 }
 0x3e1   :  { %v1418_v43 = vshrl.u32 %v1417_v5, 5  ;;  %v1419_v6 = vand.u32 31, %v1417_v5  ;;  %v1313_v7 = vsel %vm1312_vm2, %v1311_v60, 0  ;;  %v3625_v58 = vadd.s32 1, %v2397_v52 }
 0x3e2   :  { %v3618_v63 = vshrl.u32 %v1313_v7, 5  ;;  %v1315_v2 = vand.u32 31, %v1313_v7 }
 0x3e3   :  { %v1420_v8 = vsub.s32 32, %v1419_v6  ;;  %v1422_v35 = vshll.u32 %v2763_v31, %v1419_v6  ;;  %v1425_v27 = vshll.u32 %v2764_v33, %v1419_v6  ;;  %v1428_v9 = vshll.u32 %v2765_v36, %v1419_v6 }
 0x3e4   :  { %v1431_v3 = vshll.u32 %v2766_v38, %v1419_v6  ;;  %v1434_v29 = vshll.u32 %v2767_v40, %v1419_v6  ;;  %vm1437_vm3 = vcmp.lt.s32.totalorder %v1418_v43, 1  ;;  %vm1438_vm4 = vcmp.lt.s32.totalorder %v1418_v43, 2 }
 0x3e5   :  { %v1423_v15 = vshrl.u32 %v2764_v33, %v1420_v8  ;;  %v1426_v59 = vshrl.u32 %v2765_v36, %v1420_v8  ;;  %v1429_v30 = vshrl.u32 %v2766_v38, %v1420_v8  ;;  %v1421_v25 = vshrl.u32 %v2763_v31, %v1420_v8 }
 0x3e6   :  { %v1432_v32 = vshrl.u32 %v2767_v40, %v1420_v8  ;;  %v1435_v62 = vshrl.u32 %v2768_v47, %v1420_v8  ;;  %vm1439_vm5 = vcmp.lt.s32.totalorder %v1418_v43, 3  ;;  %v1316_v50 = vsub.s32 32, %v1315_v2 }
 0x3e7   :  { %v1424_v22 = vor.u32 %v1423_v15, %v1422_v35  ;;  %v1427_v34 = vor.u32 %v1426_v59, %v1425_v27  ;;  %v1430_v56 = vor.u32 %v1429_v30, %v1428_v9  ;;  %vm1440_vm6 = vcmp.lt.s32.totalorder %v1418_v43, 4 }
 0x3e8   :  { %v1433_v55 = vor.u32 %v1432_v32, %v1431_v3  ;;  %v1436_v44 = vor.u32 %v1435_v62, %v1434_v29  ;;  %v1318_v51 = vshll.u32 %v2763_v31, %v1315_v2  ;;  %v1321_v18 = vshll.u32 %v2764_v33, %v1315_v2 }
 0x3e9   :  { %v1441_v17 = vsel %vm1437_vm3, %v1421_v25, %v1424_v22  ;;  %v1442_v45 = vsel %vm1440_vm6, %v1430_v56, 2102212464  ;;  %v1445_v46 = vsel %vm1437_vm3, %v1424_v22, %v1427_v34  ;;  %v1449_v23 = vsel %vm1437_vm3, %v1427_v34, %v1430_v56 }
 0x3ea   :  { %v1443_v49 = vsel %vm1439_vm5, %v1427_v34, %v1442_v45  ;;  %v1446_v48 = vsel %vm1440_vm6, %v1433_v55, 920167782  ;;  %v1450_v53 = vsel %vm1440_vm6, %v1436_v44, 1326507024  ;;  %v1317_v54 = vshrl.u32 %v2763_v31, %v1316_v50 }
 0x3eb   :  { %v1447_v61 = vsel %vm1439_vm5, %v1430_v56, %v1446_v48  ;;  %v1451_v24 = vsel %vm1439_vm5, %v1433_v55, %v1450_v53  ;;  %v1319_v39 = vshrl.u32 %v2764_v33, %v1316_v50  ;;  %v1444_v41 = vsel %vm1438_vm4, %v1441_v17, %v1443_v49 }
 0x3ec   :  { %v1448_v37 = vsel %vm1438_vm4, %v1445_v46, %v1447_v61  ;;  %v1452_v42 = vsel %vm1438_vm4, %v1449_v23, %v1451_v24  ;;  %v1322_v14 = vshrl.u32 %v2765_v36, %v1316_v50  ;;  %v1324_v7 = vshll.u32 %v2765_v36, %v1315_v2 }
 0x3ed   :  { %v3651_v60 = vmul.u32.u64.low %v3616_v21, %v1452_v42  ;;  %v3652_v19 = vmul.u32.u64.high %v3616_v21, %v1452_v42, %v3651_v60  ;;  %v3655_v4 = vmul.u32.u64.low %v3616_v21, %v1448_v37  ;;  %v3656_v5 = vmul.u32.u64.high %v3616_v21, %v1448_v37, %v3655_v4 }
 0x3ee   :  { %v1320_v52 = vor.u32 %v1319_v39, %v1318_v51  ;;  %v1323_v6 = vor.u32 %v1322_v14, %v1321_v18  ;;  %v1325_v8 = vshrl.u32 %v2766_v38, %v1316_v50  ;;  %v1460_v35 = vmul.u32 %v3616_v21, %v1444_v41 }
 0x3ef   :  { %v1327_v43 = vshll.u32 %v2766_v38, %v1315_v2  ;;  %v1328_v27 = vshrl.u32 %v2767_v40, %v1316_v50  ;;  %v1331_v9 = vshrl.u32 %v2768_v47, %v1316_v50  ;;  %v1330_v29 = vshll.u32 %v2767_v40, %v1315_v2 }
 0x3f0   :  { %v1326_v3 = vor.u32 %v1325_v8, %v1324_v7  ;;  %vm1333_vm7 = vcmp.lt.s32.totalorder %v3618_v63, 1  ;;  %vm1334_vm8 = vcmp.lt.s32.totalorder %v3618_v63, 2  ;;  %vm1462_vm9 = vc.u32 %v3652_v19, %v3655_v4 }
 0x3f1   :  { %v1463_v15 = vadd.s32 1, %v3656_v5  ;;  %v1329_v59 = vor.u32 %v1328_v27, %v1327_v43  ;;  %vm1335_vm10 = vcmp.lt.s32.totalorder %v3618_v63, 3  ;;  %v1332_v21 = vor.u32 %v1331_v9, %v1330_v29 }
 0x3f2   :  { %vm1336_vm11 = vcmp.lt.s32.totalorder %v3618_v63, 4  ;;  %v1337_v30 = vsel %vm1333_vm7, %v1317_v54, %v1320_v52  ;;  %v1341_v25 = vsel %vm1333_vm7, %v1320_v52, %v1323_v6  ;;  %v1345_v22 = vsel %vm1333_vm7, %v1323_v6, %v1326_v3 }
 0x3f3   :  { %v1464_v32 = vsel %vm1462_vm9, %v1463_v15, %v3656_v5  ;;  %v1338_v62 = vsel %vm1336_vm11, %v1326_v3, 2102212464  ;;  %v1342_v2 = vsel %vm1336_vm11, %v1329_v59, 920167782  ;;  %v1346_v55 = vsel %vm1336_vm11, %v1332_v21, 1326507024 }
 0x3f4   :  { %v1465_v34 = vadd.s32 %v1464_v32, %v1460_v35  ;;  %v1339_v56 = vsel %vm1335_vm10, %v1323_v6, %v1338_v62  ;;  %v1343_v50 = vsel %vm1335_vm10, %v1326_v3, %v1342_v2  ;;  %v1347_v51 = vsel %vm1335_vm10, %v1329_v59, %v1346_v55 }
 0x3f5   :  { %v1344_v44 = vsel %vm1334_vm8, %v1341_v25, %v1343_v50  ;;  %vm1624_vm12 = vcmp.gt.s32.totalorder %v3625_v58, 0  ;;  %v1512_v17 = vand.u32 2139095040, %v3605_v26  ;;  %v1348_v46 = vsel %vm1334_vm8, %v1345_v22, %v1347_v51 }
 0x3f6   :  { %v1466_v45 = vadd.s32 536870912, %v1465_v34  ;;  %v3679_v23 = vmul.u32.u64.low %v3620_v10, %v1344_v44  ;;  %v3680_v49 = vmul.u32.u64.high %v3620_v10, %v1344_v44, %v3679_v23  ;;  %v1340_v48 = vsel %vm1334_vm8, %v1337_v30, %v1339_v56 }
 0x3f7   :  { %v3686_v53 = vmul.u32.u64.low %v3620_v10, %v1348_v46  ;;  %v3687_v18 = vmul.u32.u64.high %v3620_v10, %v1348_v46, %v3686_v53  ;;  %v1625_v61 = vsel %vm1624_vm12, %v3625_v58, 0  ;;  %v3693_v39 = vadd.s32 %v3655_v4, %v3652_v19 }
 0x3f8   :  { %v3690_v24 = vshrl.u32 %v1466_v45, 30  ;;  %v1627_v54 = vand.u32 31, %v1625_v61  ;;  %v3697_v41 = vshll.u32 %v1621_v11, 8  ;;  %v1513_v37 = vshrl.u32 %v1512_v17, 23 }
 0x3f9   :  { %v3701_v63 = vand.u32 8388607, %v1509_v13  ;;  %v1356_v14 = vmul.u32 %v3620_v10, %v1340_v48  ;;  %v1359_v58 = vadd.s32 1, %v3680_v49  ;;  %vm1358_vm13 = vc.u32 %v3687_v18, %v3679_v23 }
 0x3fa   :  { %v1468_v42 = vshll.u32 %v3690_v24, 30  ;;  %v1628_v60 = vsub.s32 32, %v1627_v54  ;;  %v1626_v19 = vshrl.u32 %v1625_v61, 5  ;;  %v1630_v0 = vshll.u32 %v2763_v31, %v1627_v54 }
 0x3fb   :  { %v1633_v11 = vshll.u32 %v2764_v33, %v1627_v54  ;;  %v1360_v5 = vsel %vm1358_vm13, %v1359_v58, %v3680_v49  ;;  %v1636_v6 = vshll.u32 %v2765_v36, %v1627_v54  ;;  %v1639_v35 = vshll.u32 %v2766_v38, %v1627_v54 }
 0x3fc   :  { %v3710_v4 = vsub.s32 %v1465_v34, %v1468_v42  ;;  %v1631_v52 = vshrl.u32 %v2764_v33, %v1628_v60  ;;  %v1361_v10 = vadd.s32 %v1360_v5, %v1356_v14  ;;  %v1634_v7 = vshrl.u32 %v2765_v36, %v1628_v60 }
 0x3fd   :  { %v1637_v8 = vshrl.u32 %v2766_v38, %v1628_v60  ;;  %v1640_v9 = vshrl.u32 %v2767_v40, %v1628_v60  ;;  %v1642_v3 = vshll.u32 %v2767_v40, %v1627_v54  ;;  %v1643_v21 = vshrl.u32 %v2768_v47, %v1628_v60 }
 0x3fe   :  { %v1471_v43 = vsub.s32 0, %v3710_v4  ;;  %v1632_v27 = vor.u32 %v1631_v52, %v1630_v0  ;;  %v1362_v29 = vadd.s32 536870912, %v1361_v10  ;;  %v1635_v15 = vor.u32 %v1634_v7, %v1633_v11 }
 0x3ff   :  { %v1638_v59 = vor.u32 %v1637_v8, %v1636_v6  ;;  %v1629_v25 = vshrl.u32 %v2763_v31, %v1628_v60  ;;  %v1641_v32 = vor.u32 %v1640_v9, %v1639_v35  ;;  %v2393_v62 = vadd.s32 4294967169, %v1513_v37 }
 0x400   :  { %v2390_v30 = vmin.u32 %v1471_v43, %v3710_v4  ;;  %v3724_v2 = vshrl.u32 %v1362_v29, 30  ;;  %v1644_v22 = vor.u32 %v1643_v21, %v1642_v3  ;;  %vm1645_vm15 = vcmp.lt.s32.totalorder %v1626_v19, 1 }
 0x401   :  { %vm1648_vm0 = vcmp.lt.s32.totalorder %v1626_v19, 4  ;;  %vm1646_vm1 = vcmp.lt.s32.totalorder %v1626_v19, 2  ;;  %v1653_v50 = vsel %vm1645_vm15, %v1632_v27, %v1635_v15  ;;  %vm1647_vm2 = vcmp.lt.s32.totalorder %v1626_v19, 3 }
 0x402   :  { %v1473_v34 = vclz %v2390_v30  ;;  %v1650_v56 = vsel %vm1648_vm0, %v1638_v59, 2102212464  ;;  %v1364_v55 = vshll.u32 %v3724_v2, 30  ;;  %v1654_v44 = vsel %vm1648_vm0, %v1641_v32, 920167782 }
 0x403   :  { %v1657_v51 = vsel %vm1645_vm15, %v1635_v15, %v1638_v59  ;;  %v1649_v45 = vsel %vm1645_vm15, %v1629_v25, %v1632_v27  ;;  %v1655_v46 = vsel %vm1647_vm2, %v1638_v59, %v1654_v44  ;;  %v1658_v49 = vsel %vm1648_vm0, %v1644_v22, 1326507024 }
 0x404   :  { %v2391_v17 = vadd.s32 4294967294, %v1473_v34  ;;  %v3727_v48 = vsub.s32 %v1361_v10, %v1364_v55  ;;  %v1651_v53 = vsel %vm1647_vm2, %v1635_v15, %v1650_v56  ;;  %v1656_v61 = vsel %vm1646_vm1, %v1653_v50, %v1655_v46 }
 0x405   :  { %v1659_v54 = vsel %vm1647_vm2, %v1641_v32, %v1658_v49  ;;  %v3732_v42 = vmul.u32.u64.low %v3697_v41, %v1656_v61  ;;  %v3733_v14 = vmul.u32.u64.high %v3697_v41, %v1656_v61, %v3732_v42  ;;  %v1652_v6 = vsel %vm1646_vm1, %v1649_v45, %v1651_v53 }
 0x406   :  { %vm2392_vm3 = vcmp.lt.s32.totalorder %v2391_v17, 0  ;;  %v1660_v37 = vsel %vm1646_vm1, %v1657_v51, %v1659_v54  ;;  %v1367_v60 = vsub.s32 0, %v3727_v48  ;;  %v1519_v10 = vadd.s32 1, %v2393_v62 }
 0x407   :  { %v1476_v58 = vsel %vm2392_vm3, 0, %v2391_v17  ;;  %v3738_v0 = vmul.u32.u64.low %v3697_v41, %v1660_v37  ;;  %v3739_v11 = vmul.u32.u64.high %v3697_v41, %v1660_v37, %v3738_v0  ;;  %v1517_v35 = vor.u32 8388608, %v3701_v63 }
 0x408   :  { %v1477_v5 = vsub.s32 32, %v1476_v58  ;;  %v1481_v52 = vsub.s32 4294967266, %v1476_v58  ;;  %v1478_v7 = vshll.u32 %v3710_v4, %v1476_v58  ;;  %v2386_v8 = vmin.u32 %v1367_v60, %v3727_v48 }
 0x409   :  { %v1671_v9 = vadd.s32 1, %v3733_v14  ;;  %vm1520_vm4 = vcmp.gt.s32.totalorder %v1519_v10, 0  ;;  %v1668_v29 = vmul.u32 %v3697_v41, %v1652_v6  ;;  %vm1670_vm5 = vc.u32 %v3739_v11, %v3732_v42 }
 0x40a   :  { %v1479_v43 = vshrl.u32 %v3693_v39, %v1477_v5  ;;  %v1482_v27 = vadd.s32 127, %v1481_v52  ;;  %v1369_v3 = vclz %v2386_v8  ;;  %v1521_v19 = vsel %vm1520_vm4, %v1519_v10, 0 }
 0x40b   :  { %v1357_v4 = vadd.s32 %v3679_v23, %v3687_v18  ;;  %v1672_v63 = vsel %vm1670_vm5, %v1671_v9, %v3733_v14  ;;  %vm1407_vm6 = vcmp.lt.s32.totalorder %v3589_v20, 0  ;;  %v3754_v30 = vshrl.u32 %v1521_v19, 5 }
 0x40c   :  { %v1480_v15 = vor.u32 %v1479_v43, %v1478_v7  ;;  %v1483_v59 = vshll.u32 %v1482_v27, 23  ;;  %v2387_v39 = vadd.s32 4294967294, %v1369_v3  ;;  %v1673_v21 = vadd.s32 %v1672_v63, %v1668_v29 }
 0x40d   :  { %v1523_v25 = vand.u32 31, %v1521_v19  ;;  %vm3758_vm7 = vcmp.le.f32.partialorder %v1405_v28, 0.7853982  ;;  %v3762_v62 = vshll.u32 %v1517_v35, 8  ;;  %v1387_v23 = vsub.s32 4, %v3724_v2 }
 0x40e   :  { %v1484_v32 = vor.u32 4788187, %v1483_v59  ;;  %v1491_v18 = vsub.s32 4, %v3690_v24  ;;  %v1487_v22 = vcvt.s32.f32 %v1480_v15  ;;  %vm2388_vm8 = vcmp.lt.s32.totalorder %v2387_v39, 0 }
 0x40f   :  { %v1674_v34 = vadd.s32 536870912, %v1673_v21  ;;  %v1524_v56 = vsub.s32 32, %v1523_v25  ;;  %v1372_v55 = vsel %vm2388_vm8, 0, %v2387_v39  ;;  %v1526_v44 = vshll.u32 %v2763_v31, %v1523_v25 }
 0x410   :  { %v1485_v50 = vand.u32 2147483647, %v1484_v32  ;;  %v1529_v28 = vshll.u32 %v2764_v33, %v1523_v25  ;;  %v1373_v51 = vsub.s32 32, %v1372_v55  ;;  %v1377_v17 = vsub.s32 4294967266, %v1372_v55 }
 0x411   :  { %v3768_v45 = vshrl.u32 %v1674_v34, 30  ;;  %v1532_v46 = vshll.u32 %v2765_v36, %v1523_v25  ;;  %vm1541_vm9 = vcmp.lt.s32.totalorder %v3754_v30, 1  ;;  %v1374_v53 = vshll.u32 %v3727_v48, %v1372_v55 }
 0x412   :  { %v1488_v49 = vmul.f32 %v1487_v22, %v1485_v50  ;;  %v1527_v61 = vshrl.u32 %v2764_v33, %v1524_v56  ;;  %v1530_v54 = vshrl.u32 %v2765_v36, %v1524_v56  ;;  %v1375_v37 = vshrl.u32 %v1357_v4, %v1373_v51 }
 0x413   :  { %v1378_v14 = vadd.s32 127, %v1377_v17  ;;  %v1676_v58 = vshll.u32 %v3768_v45, 30  ;;  %v1533_v60 = vshrl.u32 %v2766_v38, %v1524_v56  ;;  %v1535_v6 = vshll.u32 %v2766_v38, %v1523_v25 }
 0x414   :  { %v1489_v0 = vxor.u32 2147483648, %v1488_v49  ;;  %v1528_v5 = vor.u32 %v1527_v61, %v1526_v44  ;;  %v1531_v52 = vor.u32 %v1530_v54, %v1529_v28  ;;  %vm1303_vm10 = vcmp.lt.s32.totalorder %v3591_v16, 0 }
 0x415   :  { %v1376_v10 = vor.u32 %v1375_v37, %v1374_v53  ;;  %v1379_v7 = vshll.u32 %v1378_v14, 23  ;;  %v3779_v48 = vsub.s32 %v1673_v21, %v1676_v58  ;;  %v1534_v8 = vor.u32 %v1533_v60, %v1532_v46 }
 0x416   :  { %v1490_v35 = vsel %vm1407_vm6, %v1489_v0, %v1488_v49  ;;  %v1536_v43 = vshrl.u32 %v2767_v40, %v1524_v56  ;;  %v1538_v27 = vshll.u32 %v2767_v40, %v1523_v25  ;;  %v1539_v9 = vshrl.u32 %v2768_v47, %v1524_v56 }
 0x417   :  { %v1493_v3 = vsel %vm3758_vm7, %v3589_v20, %v1490_v35  ;;  %vm3791_vm11 = vcmp.le.f32.partialorder %v1301_v1, 0.7853982  ;;  %v1380_v19 = vor.u32 4788187, %v1379_v7  ;;  %v1679_v15 = vsub.s32 0, %v3779_v48 }
 0x418   :  { %v1525_v59 = vshrl.u32 %v2763_v31, %v1524_v56  ;;  %2730 = vcosq.f32 %v1493_v3  ;;  %v1383_v4 = vcvt.s32.f32 %v1376_v10  ;;  %v1537_v63 = vor.u32 %v1536_v43, %v1535_v6 }
 0x419   :  { %v1540_v39 = vor.u32 %v1539_v9, %v1538_v27  ;;  %2732 = vsinq.f32 %v1493_v3  ;;  %v1381_v21 = vand.u32 2147483647, %v1380_v19  ;;  %v2398_v25 = vmin.u32 %v1679_v15, %v3779_v48 }
 0x41a   :  { %vm1544_vm12 = vcmp.lt.s32.totalorder %v3754_v30, 4  ;;  %vm1543_vm13 = vcmp.lt.s32.totalorder %v3754_v30, 3  ;;  %v1549_v32 = vsel %vm1541_vm9, %v1528_v5, %v1531_v52  ;;  %vm1542_vm15 = vcmp.lt.s32.totalorder %v3754_v30, 2 }
 0x41b   :  { %v1546_v1 = vsel %vm1544_vm12, %v1534_v8, 2102212464  ;;  %v1550_v22 = vsel %vm1544_vm12, %v1537_v63, 920167782  ;;  %v1384_v34 = vmul.f32 %v1383_v4, %v1381_v21  ;;  %v1681_v50 = vclz %v2398_v25 }
 0x41c   :  { %v1551_v56 = vsel %vm1543_vm13, %v1534_v8, %v1550_v22  ;;  %v1545_v55 = vsel %vm1541_vm9, %v1525_v59, %v1528_v5  ;;  %v1553_v28 = vsel %vm1541_vm9, %v1531_v52, %v1534_v8  ;;  %v1554_v51 = vsel %vm1544_vm12, %v1540_v39, 1326507024 }
 0x41d   :  { %v1552_v44 = vsel %vm1542_vm15, %v1549_v32, %v1551_v56  ;;  %v1385_v17 = vxor.u32 2147483648, %v1384_v34  ;;  %v2399_v46 = vadd.s32 4294967294, %v1681_v50  ;;  %v1547_v49 = vsel %vm1543_vm13, %v1531_v52, %v1546_v1 }
 0x41e   :  { %v1555_v53 = vsel %vm1543_vm13, %v1537_v63, %v1554_v51  ;;  %v3812_v54 = vmul.u32.u64.low %v3762_v62, %v1552_v44  ;;  %v3813_v37 = vmul.u32.u64.high %v3762_v62, %v1552_v44, %v3812_v54  ;;  %v1388_v14 = vsel %vm1303_vm10, %v1387_v23, %v3724_v2 }
 0x41f   :  { %v1556_v61 = vsel %vm1542_vm15, %v1553_v28, %v1555_v53  ;;  %v1386_v58 = vsel %vm1303_vm10, %v1385_v17, %v1384_v34  ;;  %vm2400_vm0 = vcmp.lt.s32.totalorder %v2399_v46, 0  ;;  %v1548_v6 = vsel %vm1542_vm15, %v1545_v55, %v1547_v49 }
 0x420   :  { %v3824_v60 = vmul.u32.u64.low %v3762_v62, %v1556_v61  ;;  %v3825_v0 = vmul.u32.u64.high %v3762_v62, %v1556_v61, %v3824_v60  ;;  %v1389_v5 = vsel %vm3791_vm11, %v3591_v16, %v1386_v58  ;;  %v1684_v52 = vsel %vm2400_vm0, 0, %v2399_v46 }
 0x421   :  { %v1492_v2 = vsel %vm1407_vm6, %v1491_v18, %v3690_v24  ;;  %2734 = vcosq.f32 %v1389_v5  ;;  %v1689_v23 = vsub.s32 4294967266, %v1684_v52  ;;  %v1390_v10 = vsel %vm3791_vm11, 0, %v1388_v14 }
 0x422   :  { %v2731_v7 = vpop.eup %2730  ;;  %2736 = vsinq.f32 %v1389_v5  ;;  %v1567_v8 = vadd.s32 1, %v3813_v37  ;;  %v1494_v35 = vsel %vm3758_vm7, 0, %v1492_v2  ;;  %v1685_v43 = vsub.s32 32, %v1684_v52 }
 0x423   :  { %v2733_v30 = vpop.eup %2732  ;;  %v1690_v27 = vadd.s32 127, %v1689_v23  ;;  %v1564_v9 = vmul.u32 %v3762_v62, %v1548_v6  ;;  %vm1566_vm1 = vc.u32 %v3825_v0, %v3812_v54  ;;  %v1394_v18 = vadd.s32 3, %v1390_v10 }
 0x424   :  { %v1568_v24 = vsel %vm1566_vm1, %v1567_v8, %v3813_v37  ;;  %v1669_v3 = vadd.s32 %v3732_v42, %v3739_v11  ;;  %v1498_v15 = vadd.s32 3, %v1494_v35  ;;  %v1502_v59 = vxor.u32 2147483648, %v2733_v30 }
 0x425   :  { %v1691_v29 = vshll.u32 %v1690_v27, 23  ;;  %v1569_v19 = vadd.s32 %v1568_v24, %v1564_v9  ;;  %v1505_v39 = vxor.u32 2147483648, %v2731_v7  ;;  %v1395_v21 = vand.u32 3, %v1394_v18 }
 0x426   :  { %v1687_v41 = vshrl.u32 %v1669_v3, %v1685_v43  ;;  %v1499_v63 = vand.u32 3, %v1498_v15  ;;  %v1686_v62 = vshll.u32 %v3779_v48, %v1684_v52  ;;  %vm1497_vm6 = vweird.f32 %v3589_v20 }
 0x427   :  { %v1570_v4 = vadd.s32 536870912, %v1569_v19  ;;  %v1692_v25 = vor.u32 4788187, %v1691_v29  ;;  %vm1400_vm5 = vcmp.eq.s32.totalorder %v1395_v21, 2  ;;  %vm1397_vm7 = vcmp.eq.s32.totalorder %v1395_v21, 0 }
 0x428   :  { %vm1501_vm2 = vcmp.eq.s32.totalorder %v1499_v63, 0  ;;  %vm1504_vm3 = vcmp.eq.s32.totalorder %v1499_v63, 2  ;;  %v1688_v34 = vor.u32 %v1687_v41, %v1686_v62  ;;  %vm1500_vm4 = vcmp.lt.s32.totalorder %v1499_v63, 2 }
 0x429   :  { %v3849_v1 = vshrl.u32 %v1570_v4, 30  ;;  %v1503_v32 = vsel %vm1501_vm2, %v2731_v7, %v1502_v59  ;;  %v1506_v11 = vsel %vm1504_vm3, %v1505_v39, %v2733_v30  ;;  %v1693_v44 = vand.u32 2147483647, %v1692_v25 }
 0x42a   :  { %v1507_v55 = vsel %vm1500_vm4, %v1503_v32, %v1506_v11  ;;  %v1695_v46 = vcvt.s32.f32 %v1688_v34  ;;  %vm1396_vm8 = vcmp.lt.s32.totalorder %v1395_v21, 2  ;;  %vm1393_vm9 = vweird.f32 %v3591_v16 }
 0x42b   :  { %v2735_v22 = vpop.eup %2734  ;;  %v1572_v42 = vshll.u32 %v3849_v1, 30  ;;  %v1508_v51 = vsel %vm1497_vm6, nan, %v1507_v55  ;;  %vm1615_vm11 = vcmp.lt.s32.totalorder %v3599_v12, 0  ;;  %v1565_v16 = vadd.s32 %v3812_v54, %v3825_v0 }
 0x42c   :  { %v2737_v50 = vpop.eup %2736  ;;  %v1401_v56 = vxor.u32 2147483648, %v2735_v22  ;;  %v1696_v37 = vmul.f32 %v1695_v46, %v1693_v44  ;;  %vm3861_vm12 = vcmp.le.f32.partialorder %v1613_v57, 0.7853982  ;;  %v1699_v24 = vsub.s32 4, %v3768_v45 }
 0x42d   :  { %v1573_v48 = vsub.s32 %v1569_v19, %v1572_v42  ;;  %v1398_v28 = vxor.u32 2147483648, %v2737_v50  ;;  %v1595_v29 = vsub.s32 4, %v3849_v1  ;;  %vm1511_vm13 = vcmp.lt.s32.totalorder %v3605_v26, 0 }
 0x42e   :  { %v1402_v17 = vsel %vm1400_vm5, %v1401_v56, %v2737_v50  ;;  %v1697_v20 = vxor.u32 2147483648, %v1696_v37  ;;  %v1700_v57 = vsel %vm1615_vm11, %v1699_v24, %v3768_v45  ;;  %vm1510_vm15 = vcmp.le.f32.partialorder %v1509_v13, 0.7853982 }
 0x42f   :  { %v1575_v49 = vsub.s32 0, %v1573_v48  ;;  %v1399_v53 = vsel %vm1397_vm7, %v2735_v22, %v1398_v28  ;;  %v1702_v15 = vsel %vm3861_vm12, 0, %v1700_v57  ;;  %v1596_v41 = vsel %vm1511_vm13, %v1595_v29, %v3849_v1 }
 0x430   :  { %v1403_v61 = vsel %vm1396_vm8, %v1399_v53, %v1402_v17  ;;  %v1698_v2 = vsel %vm1615_vm11, %v1697_v20, %v1696_v37  ;;  %v1706_v63 = vadd.s32 3, %v1702_v15  ;;  %v1598_v21 = vsel %vm1510_vm15, 0, %v1596_v41  ;;  %v2403_v53 = vld [vmem:[%s4164_s2 + $0x50] sm:$0xff]  ;;  %v1730_v37 = vpop.permute.xlu0 %1729 }
 0x431   :  { %v2394_v14 = vmin.u32 %v1575_v49, %v1573_v48  ;;  %v1404_v58 = vsel %vm1393_vm9, nan, %v1403_v61  ;;  %v1701_v43 = vsel %vm3861_vm12, %v3599_v12, %v1698_v2  ;;  %v1602_v25 = vadd.s32 3, %v1598_v21  ;;  %v2402_v49 = vld [vmem:[%s4164_s2 + $0x48] sm:$0xff] }
 0x432   :  { %v2617_v60 = vpack.c.bf16 %v1508_v51, %v1404_v58  ;;  %2738 = vcosq.f32 %v1701_v43  ;;  %v1707_v62 = vand.u32 3, %v1706_v63  ;;  %vm1705_vm5 = vweird.f32 %v3599_v12  ;;  %v2404_v12 = vld [vmem:[%s4164_s2 + $0x58] sm:$0xff] }
 0x433   :  { %v1577_v5 = vclz %v2394_v14  ;;  %2740 = vsinq.f32 %v1701_v43  ;;  %v1603_v34 = vand.u32 3, %v1602_v25  ;;  %vm1601_vm7 = vweird.f32 %v3605_v26 }
 0x434   :  { %2618 = vmatprep.subr.bf16.mxu1 %v2617_v60  ;;  %vm1709_vm0 = vcmp.eq.s32.totalorder %v1707_v62, 0  ;;  %vm1712_vm1 = vcmp.eq.s32.totalorder %v1707_v62, 2  ;;  %vm1708_vm2 = vcmp.lt.s32.totalorder %v1707_v62, 2 }
 0x435   :  { %v2395_v52 = vadd.s32 4294967294, %v1577_v5  ;;  %2620 = vmatpush3.bf16.msra.mxu1 %v2617_v60  ;;  %vm1608_vm3 = vcmp.eq.s32.totalorder %v1603_v34, 2  ;;  %vm1605_vm4 = vcmp.eq.s32.totalorder %v1603_v34, 0  ;;  %vm1604_vm6 = vcmp.lt.s32.totalorder %v1603_v34, 2 }
 0x437   :  { %vm2396_vm10 = vcmp.lt.s32.totalorder %v2395_v52, 0 }
 0x438   :  { %v1580_v6 = vsel %vm2396_vm10, 0, %v2395_v52 }
 0x439   :  { %v1581_v23 = vsub.s32 32, %v1580_v6  ;;  %v1585_v10 = vsub.s32 4294967266, %v1580_v6  ;;  %v1582_v8 = vshll.u32 %v1573_v48, %v1580_v6 }
 0x43b   :  { %v1583_v35 = vshrl.u32 %v1565_v16, %v1581_v23  ;;  %v1586_v30 = vadd.s32 127, %v1585_v10 }
 0x43c   :  { %v2739_v39 = vpop.eup %2738 }
 0x43d   :  { %v1584_v27 = vor.u32 %v1583_v35, %v1582_v8  ;;  %v1587_v9 = vshll.u32 %v1586_v30, 23  ;;  %v2741_v45 = vpop.eup %2740  ;;  %v1713_v22 = vxor.u32 2147483648, %v2739_v39 }
 0x43e   :  { %v1710_v32 = vxor.u32 2147483648, %v2741_v45 }
 0x43f   :  { %v1588_v54 = vor.u32 4788187, %v1587_v9  ;;  %v1591_v18 = vcvt.s32.f32 %v1584_v27  ;;  %v1714_v13 = vsel %vm1712_vm1, %v1713_v22, %v2741_v45 }
 0x440   :  { %v1711_v42 = vsel %vm1709_vm0, %v2739_v39, %v1710_v32 }
 0x441   :  { %v1589_v0 = vand.u32 2147483647, %v1588_v54  ;;  %v1715_v56 = vsel %vm1708_vm2, %v1711_v42, %v1714_v13 }
 0x442   :  { %v1716_v28 = vsel %vm1705_vm5, nan, %v1715_v56 }
 0x443   :  { %v1592_v3 = vmul.f32 %v1591_v18, %v1589_v0 }
 0x445   :  { %v1593_v19 = vxor.u32 2147483648, %v1592_v3 }
 0x447   :  { %v1594_v59 = vsel %vm1511_vm13, %v1593_v19, %v1592_v3 }
 0x448   :  { %v1597_v4 = vsel %vm1510_vm15, %v3605_v26, %v1594_v59  ;;  %v1735_v26 = vpop.permute.xlu1 %1734 }
 0x449   :  { %2742 = vcosq.f32 %v1597_v4 }
 0x44a   :  { %2744 = vsinq.f32 %v1597_v4 }
 0x44c   :  { %v1745_v52 = vpop.permute.xlu1 %1744 }
 0x453   :  { %v2743_v11 = vpop.eup %2742 }
 0x454   :  { %v2745_v1 = vpop.eup %2744  ;;  %v1609_v50 = vxor.u32 2147483648, %v2743_v11 }
 0x455   :  { %v1606_v55 = vxor.u32 2147483648, %v2745_v1 }
 0x456   :  { %v1610_v44 = vsel %vm1608_vm3, %v1609_v50, %v2745_v1 }
 0x457   :  { %v1607_v48 = vsel %vm1605_vm4, %v2743_v11, %v1606_v55 }
 0x458   :  { %v1611_v51 = vsel %vm1604_vm6, %v1607_v48, %v1610_v44 }
 0x459   :  { %v1612_v17 = vsel %vm1601_vm7, nan, %v1611_v51 }
 0x45a   :  { %v2621_v46 = vpack.c.bf16 %v1716_v28, %v1612_v17 }
 0x45c   :  { %2622 = vmatprep.subr.bf16.mxu1 %v2621_v46 }
 0x45d   :  { %2624 = vmatpush3.bf16.msra.mxu1 %v2621_v46 }
 0x460   :  { %2548 = vmatmul.mubr.msk.f32.vlgmr.msra.gmra.mrb[8].mxu1 %vm660_vm14, %v2402_v49 }
 0x461   :  { %2550 = vmatprep.mubr.msk.f32.mxu1 %vm660_vm14, %v2403_v53 }
 0x464   :  { %2551 = vmatmul.mubr.msk.f32.gmra.mrb[10].mxu1 %vm660_vm14, %v2404_v12 }
 0x533   :  { %v2549_v61 = vpop.f32.mrb[8].mxu1 }
 0x534   :  { %v3894_v14 = vadd.f32 %v2549_v61, %v1735_v26  ;;  %v1825_v58 = vpop.f32.mrb[9].mxu1 }
 0x535   :  { %v3896_v60 = vadd.f32 %v1825_v58, %v1730_v37 }
 0x536   :  { %v1948_v5 = vand.u32 2147483647, %v3894_v14  ;;  %v1951_v20 = vand.u32 2139095040, %v3894_v14 }
 0x537   :  { %v1844_v6 = vand.u32 2147483647, %v3896_v60  ;;  %v1847_v2 = vand.u32 2139095040, %v3896_v60  ;;  %v2552_v16 = vpop.f32.mrb[10].mxu1 }
 0x538   :  { %v1952_v23 = vshrl.u32 %v1951_v20, 23  ;;  %v3902_v10 = vadd.f32 %v2552_v16, %v1745_v52  ;;  %v3904_v7 = vpop.f32.mrb[11].mxu1  ;;  %v1955_v8 = vand.u32 8388607, %v1948_v5 }
 0x539   :  { %v1848_v35 = vshrl.u32 %v1847_v2, 23  ;;  %v1851_v30 = vand.u32 8388607, %v1844_v6 }
 0x53a   :  { %v2417_v43 = vadd.s32 4294967169, %v1952_v23  ;;  %v2159_v9 = vand.u32 2139095040, %v3902_v10  ;;  %v1956_v54 = vor.u32 8388608, %v1955_v8 }
 0x53b   :  { %v2413_v27 = vadd.s32 4294967169, %v1848_v35  ;;  %v1852_v0 = vor.u32 8388608, %v1851_v30 }
 0x53c   :  { %v1958_v24 = vadd.s32 1, %v2417_v43  ;;  %v2160_v57 = vshrl.u32 %v2159_v9, 23  ;;  %v3911_v41 = vshll.u32 %v1956_v54, 8 }
 0x53d   :  { %v1854_v18 = vadd.s32 1, %v2413_v27  ;;  %v3915_v63 = vshll.u32 %v1852_v0, 8 }
 0x53e   :  { %vm1959_vm14 = vcmp.gt.s32.totalorder %v1958_v24, 0  ;;  %v2425_v29 = vadd.s32 4294967169, %v2160_v57 }
 0x53f   :  { %v1960_v3 = vsel %vm1959_vm14, %v1958_v24, 0  ;;  %vm1855_vm8 = vcmp.gt.s32.totalorder %v1854_v18, 0 }
 0x540   :  { %v1961_v19 = vshrl.u32 %v1960_v3, 5  ;;  %v1962_v15 = vand.u32 31, %v1960_v3  ;;  %v1856_v59 = vsel %vm1855_vm8, %v1854_v18, 0  ;;  %v3918_v62 = vadd.s32 1, %v2425_v29 }
 0x541   :  { %v3913_v4 = vshrl.u32 %v1856_v59, 5  ;;  %v1858_v21 = vand.u32 31, %v1856_v59 }
 0x542   :  { %v1963_v39 = vsub.s32 32, %v1962_v15  ;;  %v1965_v45 = vshll.u32 %v2763_v31, %v1962_v15  ;;  %v1968_v25 = vshll.u32 %v2764_v33, %v1962_v15  ;;  %v1971_v32 = vshll.u32 %v2765_v36, %v1962_v15 }
 0x543   :  { %v1974_v22 = vshll.u32 %v2766_v38, %v1962_v15  ;;  %v1977_v34 = vshll.u32 %v2767_v40, %v1962_v15  ;;  %vm1980_vm9 = vcmp.lt.s32.totalorder %v1961_v19, 1  ;;  %vm1981_vm10 = vcmp.lt.s32.totalorder %v1961_v19, 2 }
 0x544   :  { %v1966_v42 = vshrl.u32 %v2764_v33, %v1963_v39  ;;  %v1969_v13 = vshrl.u32 %v2765_v36, %v1963_v39  ;;  %v1972_v11 = vshrl.u32 %v2766_v38, %v1963_v39  ;;  %v1964_v1 = vshrl.u32 %v2763_v31, %v1963_v39 }
 0x545   :  { %v1975_v50 = vshrl.u32 %v2767_v40, %v1963_v39  ;;  %v1978_v56 = vshrl.u32 %v2768_v47, %v1963_v39  ;;  %v1859_v28 = vsub.s32 32, %v1858_v21  ;;  %vm1982_vm11 = vcmp.lt.s32.totalorder %v1961_v19, 3 }
 0x546   :  { %v1967_v55 = vor.u32 %v1966_v42, %v1965_v45  ;;  %v1970_v44 = vor.u32 %v1969_v13, %v1968_v25  ;;  %v1973_v48 = vor.u32 %v1972_v11, %v1971_v32  ;;  %vm1983_vm12 = vcmp.lt.s32.totalorder %v1961_v19, 4 }
 0x547   :  { %v1976_v51 = vor.u32 %v1975_v50, %v1974_v22  ;;  %v1979_v17 = vor.u32 %v1978_v56, %v1977_v34  ;;  %v1861_v58 = vshll.u32 %v2763_v31, %v1858_v21  ;;  %v1862_v2 = vshrl.u32 %v2764_v33, %v1859_v28 }
 0x548   :  { %v1984_v46 = vsel %vm1980_vm9, %v1964_v1, %v1967_v55  ;;  %v1985_v49 = vsel %vm1983_vm12, %v1973_v48, 2102212464  ;;  %v1988_v53 = vsel %vm1980_vm9, %v1967_v55, %v1970_v44  ;;  %v1992_v12 = vsel %vm1980_vm9, %v1970_v44, %v1973_v48 }
 0x549   :  { %v1986_v26 = vsel %vm1982_vm11, %v1970_v44, %v1985_v49  ;;  %v1989_v61 = vsel %vm1983_vm12, %v1976_v51, 920167782  ;;  %v1993_v37 = vsel %vm1983_vm12, %v1979_v17, 1326507024  ;;  %v1864_v16 = vshll.u32 %v2764_v33, %v1858_v21 }
 0x54a   :  { %v1990_v20 = vsel %vm1982_vm11, %v1973_v48, %v1989_v61  ;;  %v1994_v52 = vsel %vm1982_vm11, %v1976_v51, %v1993_v37  ;;  %v1987_v23 = vsel %vm1981_vm10, %v1984_v46, %v1986_v26  ;;  %v1865_v30 = vshrl.u32 %v2765_v36, %v1859_v28 }
 0x54b   :  { %v1991_v8 = vsel %vm1981_vm10, %v1988_v53, %v1990_v20  ;;  %v1995_v35 = vsel %vm1981_vm10, %v1992_v12, %v1994_v52  ;;  %v1863_v54 = vor.u32 %v1862_v2, %v1861_v58  ;;  %v1867_v18 = vshll.u32 %v2765_v36, %v1858_v21  ;;  %v1740_v52 = vpop.permute.xlu0 %1739 }
 0x54c   :  { %v3941_v43 = vmul.u32.u64.low %v3911_v41, %v1995_v35  ;;  %v3942_v27 = vmul.u32.u64.high %v3911_v41, %v1995_v35, %v3941_v43  ;;  %v3945_v9 = vmul.u32.u64.low %v3911_v41, %v1991_v8  ;;  %v3946_v24 = vmul.u32.u64.high %v3911_v41, %v1991_v8, %v3945_v9 }
 0x54d   :  { %v1866_v0 = vor.u32 %v1865_v30, %v1864_v16  ;;  %v1868_v57 = vshrl.u32 %v2766_v38, %v1859_v28  ;;  %v1860_v3 = vshrl.u32 %v2763_v31, %v1859_v28  ;;  %v1870_v29 = vshll.u32 %v2766_v38, %v1858_v21 }
 0x54e   :  { %v1871_v19 = vshrl.u32 %v2767_v40, %v1859_v28  ;;  %v1874_v15 = vshrl.u32 %v2768_v47, %v1859_v28  ;;  %v2003_v59 = vmul.u32 %v3911_v41, %v1987_v23  ;;  %v1873_v45 = vshll.u32 %v2767_v40, %v1858_v21 }
 0x54f   :  { %v1869_v39 = vor.u32 %v1868_v57, %v1867_v18  ;;  %vm1876_vm13 = vcmp.lt.s32.totalorder %v3913_v4, 1  ;;  %vm2005_vm15 = vc.u32 %v3942_v27, %v3945_v9  ;;  %v2006_v25 = vadd.s32 1, %v3946_v24 }
 0x550   :  { %v1872_v32 = vor.u32 %v1871_v19, %v1870_v29  ;;  %vm1877_vm0 = vcmp.lt.s32.totalorder %v3913_v4, 2  ;;  %v1875_v22 = vor.u32 %v1874_v15, %v1873_v45  ;;  %vm1878_vm1 = vcmp.lt.s32.totalorder %v3913_v4, 3 }
 0x551   :  { %vm1879_vm2 = vcmp.lt.s32.totalorder %v3913_v4, 4  ;;  %v1884_v34 = vsel %vm1876_vm13, %v1863_v54, %v1866_v0  ;;  %v2007_v41 = vsel %vm2005_vm15, %v2006_v25, %v3946_v24  ;;  %v1888_v13 = vsel %vm1876_vm13, %v1866_v0, %v1869_v39 }
 0x552   :  { %v1881_v42 = vsel %vm1879_vm2, %v1869_v39, 2102212464  ;;  %v1885_v21 = vsel %vm1879_vm2, %v1872_v32, 920167782  ;;  %v2008_v11 = vadd.s32 %v2007_v41, %v2003_v59  ;;  %v1880_v1 = vsel %vm1876_vm13, %v1860_v3, %v1863_v54 }
 0x553   :  { %v1886_v50 = vsel %vm1878_vm1, %v1869_v39, %v1885_v21  ;;  %v1889_v56 = vsel %vm1879_vm2, %v1875_v22, 1326507024  ;;  %v1882_v55 = vsel %vm1878_vm1, %v1866_v0, %v1881_v42  ;;  %vm2167_vm3 = vcmp.gt.s32.totalorder %v3918_v62, 0 }
 0x554   :  { %v1887_v44 = vsel %vm1877_vm0, %v1884_v34, %v1886_v50  ;;  %v1890_v48 = vsel %vm1878_vm1, %v1872_v32, %v1889_v56  ;;  %v2009_v28 = vadd.s32 536870912, %v2008_v11  ;;  %v2168_v12 = vsel %vm2167_vm3, %v3918_v62, 0 }
 0x555   :  { %v1891_v51 = vsel %vm1877_vm0, %v1888_v13, %v1890_v48  ;;  %v3971_v17 = vmul.u32.u64.low %v3915_v63, %v1887_v44  ;;  %v3972_v46 = vmul.u32.u64.high %v3915_v63, %v1887_v44, %v3971_v17  ;;  %v1883_v61 = vsel %vm1877_vm0, %v1880_v1, %v1882_v55 }
 0x556   :  { %v3976_v49 = vmul.u32.u64.low %v3915_v63, %v1891_v51  ;;  %v3977_v53 = vmul.u32.u64.high %v3915_v63, %v1891_v51, %v3976_v49  ;;  %v3980_v26 = vshrl.u32 %v2009_v28, 30  ;;  %v2170_v37 = vand.u32 31, %v2168_v12 }
 0x557   :  { %v1902_v20 = vadd.s32 1, %v3972_v46  ;;  %v1899_v2 = vmul.u32 %v3915_v63, %v1883_v61  ;;  %v2156_v8 = vand.u32 2147483647, %v3902_v10  ;;  %v3992_v4 = vadd.f32 %v3904_v7, %v1740_v52 }
 0x558   :  { %v2011_v58 = vshll.u32 %v3980_v26, 30  ;;  %vm1901_vm4 = vc.u32 %v3977_v53, %v3971_v17  ;;  %v2171_v16 = vsub.s32 32, %v2170_v37  ;;  %v2173_v7 = vshll.u32 %v2763_v31, %v2170_v37 }
 0x559   :  { %v1903_v62 = vsel %vm1901_vm4, %v1902_v20, %v3972_v46  ;;  %v2163_v0 = vand.u32 8388607, %v2156_v8  ;;  %v2055_v57 = vand.u32 2139095040, %v3992_v4  ;;  %v2176_v29 = vshll.u32 %v2764_v33, %v2170_v37 }
 0x55a   :  { %v2012_v23 = vsub.s32 %v2008_v11, %v2011_v58  ;;  %v1904_v35 = vadd.s32 %v1903_v62, %v1899_v2  ;;  %v2174_v24 = vshrl.u32 %v2764_v33, %v2171_v16  ;;  %v2177_v54 = vshrl.u32 %v2765_v36, %v2171_v16 }
 0x55b   :  { %v2183_v18 = vshrl.u32 %v2767_v40, %v2171_v16  ;;  %v2180_v19 = vshrl.u32 %v2766_v38, %v2171_v16  ;;  %v2169_v59 = vshrl.u32 %v2168_v12, 5  ;;  %v2182_v39 = vshll.u32 %v2766_v38, %v2170_v37 }
 0x55c   :  { %v2014_v30 = vsub.s32 0, %v2012_v23  ;;  %v1905_v43 = vadd.s32 536870912, %v1904_v35  ;;  %v2186_v45 = vshrl.u32 %v2768_v47, %v2171_v16  ;;  %v2175_v32 = vor.u32 %v2174_v24, %v2173_v7 }
 0x55d   :  { %v2178_v22 = vor.u32 %v2177_v54, %v2176_v29  ;;  %v2179_v34 = vshll.u32 %v2765_v36, %v2170_v37  ;;  %v2164_v42 = vor.u32 8388608, %v2163_v0  ;;  %v2184_v21 = vor.u32 %v2183_v18, %v2182_v39 }
 0x55e   :  { %v2418_v63 = vmin.u32 %v2014_v30, %v2012_v23  ;;  %v4000_v3 = vshrl.u32 %v1905_v43, 30  ;;  %v2185_v13 = vshll.u32 %v2767_v40, %v2170_v37  ;;  %v2004_v11 = vadd.s32 %v3945_v9, %v3942_v27 }
 0x55f   :  { %v2172_v1 = vshrl.u32 %v2763_v31, %v2171_v16  ;;  %v2181_v50 = vor.u32 %v2180_v19, %v2179_v34  ;;  %v2056_v56 = vshrl.u32 %v2055_v57, 23  ;;  %vm2188_vm6 = vcmp.lt.s32.totalorder %v2169_v59, 1 }
 0x560   :  { %v2016_v15 = vclz %v2418_v63  ;;  %v1907_v25 = vshll.u32 %v4000_v3, 30  ;;  %v2187_v55 = vor.u32 %v2186_v45, %v2185_v13  ;;  %vm2189_vm7 = vcmp.lt.s32.totalorder %v2169_v59, 2 }
 0x561   :  { %vm2191_vm14 = vcmp.lt.s32.totalorder %v2169_v59, 4  ;;  %v2196_v28 = vsel %vm2188_vm6, %v2175_v32, %v2178_v22  ;;  %vm2190_vm8 = vcmp.lt.s32.totalorder %v2169_v59, 3  ;;  %v2200_v61 = vsel %vm2188_vm6, %v2178_v22, %v2181_v50 }
 0x562   :  { %v2419_v41 = vadd.s32 4294967294, %v2016_v15  ;;  %v4013_v48 = vsub.s32 %v1904_v35, %v1907_v25  ;;  %v2197_v49 = vsel %vm2191_vm14, %v2184_v21, 920167782  ;;  %v2193_v27 = vsel %vm2191_vm14, %v2181_v50, 2102212464 }
 0x563   :  { %v2198_v9 = vsel %vm2190_vm8, %v2181_v50, %v2197_v49  ;;  %v2201_v52 = vsel %vm2191_vm14, %v2187_v55, 1326507024  ;;  %v2192_v16 = vsel %vm2188_vm6, %v2172_v1, %v2175_v32  ;;  %v2204_v62 = vshll.u32 %v2164_v42, 8 }
 0x564   :  { %vm2420_vm5 = vcmp.lt.s32.totalorder %v2419_v41, 0  ;;  %v2199_v20 = vsel %vm2189_vm7, %v2196_v28, %v2198_v9  ;;  %v1910_v2 = vsub.s32 0, %v4013_v48  ;;  %v2421_v35 = vadd.s32 4294967169, %v2056_v56 }
 0x565   :  { %v2019_v44 = vsel %vm2420_vm5, 0, %v2419_v41  ;;  %v2202_v24 = vsel %vm2190_vm8, %v2184_v21, %v2201_v52  ;;  %v4024_v63 = vmul.u32.u64.low %v2204_v62, %v2199_v20  ;;  %v4025_v0 = vmul.u32.u64.high %v2204_v62, %v2199_v20, %v4024_v63 }
 0x566   :  { %v2020_v51 = vsub.s32 32, %v2019_v44  ;;  %v2024_v46 = vsub.s32 4294967266, %v2019_v44  ;;  %v2021_v12 = vshll.u32 %v2012_v23, %v2019_v44  ;;  %v2194_v23 = vsel %vm2190_vm8, %v2178_v22, %v2193_v27 }
 0x567   :  { %v2203_v54 = vsel %vm2189_vm7, %v2200_v61, %v2202_v24  ;;  %v2034_v29 = vsub.s32 4, %v3980_v26  ;;  %v2414_v19 = vmin.u32 %v1910_v2, %v4013_v48  ;;  %v2195_v15 = vsel %vm2189_vm7, %v2192_v16, %v2194_v23 }
 0x568   :  { %v2022_v37 = vshrl.u32 %v2004_v11, %v2020_v51  ;;  %v2025_v58 = vadd.s32 127, %v2024_v46  ;;  %v4028_v57 = vmul.u32.u64.low %v2204_v62, %v2203_v54  ;;  %v4029_v7 = vmul.u32.u64.high %v2204_v62, %v2203_v54, %v4028_v57 }
 0x569   :  { %v2062_v39 = vadd.s32 1, %v2421_v35  ;;  %vm1950_vm9 = vcmp.lt.s32.totalorder %v3894_v14, 0  ;;  %v2214_v32 = vadd.s32 1, %v4025_v0  ;;  %v2211_v34 = vmul.u32 %v2204_v62, %v2195_v15 }
 0x56a   :  { %v2023_v30 = vor.u32 %v2022_v37, %v2021_v12  ;;  %v2026_v43 = vshll.u32 %v2025_v58, 23  ;;  %vm2213_vm10 = vc.u32 %v4029_v7, %v4024_v63  ;;  %v2035_v41 = vsel %vm1950_vm9, %v2034_v29, %v3980_v26 }
 0x56b   :  { %vm2063_vm11 = vcmp.gt.s32.totalorder %v2062_v39, 0  ;;  %v1912_v42 = vclz %v2414_v19  ;;  %v2215_v21 = vsel %vm2213_vm10, %v2214_v32, %v4025_v0  ;;  %vm1949_vm12 = vcmp.le.f32.partialorder %v1948_v5, 0.7853982 }
 0x56c   :  { %v2027_v18 = vor.u32 4788187, %v2026_v43  ;;  %v2030_v25 = vcvt.s32.f32 %v2023_v30  ;;  %v2064_v59 = vsel %vm2063_vm11, %v2062_v39, 0  ;;  %v2216_v11 = vadd.s32 %v2215_v21, %v2211_v34 }
 0x56d   :  { %v2066_v1 = vand.u32 31, %v2064_v59  ;;  %v2037_v56 = vsel %vm1949_vm12, 0, %v2035_v41  ;;  %v2052_v44 = vand.u32 2147483647, %v3992_v4  ;;  %v2415_v51 = vadd.s32 4294967294, %v1912_v42 }
 0x56e   :  { %v2028_v45 = vand.u32 2147483647, %v2027_v18  ;;  %v2217_v55 = vadd.s32 536870912, %v2216_v11  ;;  %v2041_v49 = vadd.s32 3, %v2037_v56  ;;  %v2065_v58 = vshrl.u32 %v2064_v59, 5 }
 0x56f   :  { %v2067_v46 = vsub.s32 32, %v2066_v1  ;;  %v2059_v27 = vand.u32 8388607, %v2052_v44  ;;  %vm2416_vm13 = vcmp.lt.s32.totalorder %v2415_v51, 0  ;;  %v2078_v9 = vshll.u32 %v2766_v38, %v2066_v1 }
 0x570   :  { %v2031_v22 = vmul.f32 %v2030_v25, %v2028_v45  ;;  %v4044_v26 = vshrl.u32 %v2217_v55, 30  ;;  %v2042_v2 = vand.u32 3, %v2041_v49  ;;  %v2069_v16 = vshll.u32 %v2763_v31, %v2066_v1 }
 0x571   :  { %v2070_v5 = vshrl.u32 %v2764_v33, %v2067_v46  ;;  %v2079_v61 = vshrl.u32 %v2767_v40, %v2067_v46  ;;  %v2073_v20 = vshrl.u32 %v2765_v36, %v2067_v46  ;;  %v2076_v52 = vshrl.u32 %v2766_v38, %v2067_v46 }
 0x572   :  { %v2032_v13 = vxor.u32 2147483648, %v2031_v22  ;;  %v2219_v12 = vshll.u32 %v4044_v26, 30  ;;  %v2082_v35 = vshrl.u32 %v2768_v47, %v2067_v46  ;;  %v2072_v43 = vshll.u32 %v2764_v33, %v2066_v1 }
 0x573   :  { %v2080_v62 = vor.u32 %v2079_v61, %v2078_v9  ;;  %v2075_v23 = vshll.u32 %v2765_v36, %v2066_v1  ;;  %v4061_v24 = vsel %vm2416_vm13, 0, %v2415_v51  ;;  %v2060_v54 = vor.u32 8388608, %v2059_v27 }
 0x574   :  { %v2033_v50 = vsel %vm1950_vm9, %v2032_v13, %v2031_v22  ;;  %v4052_v37 = vsub.s32 %v2216_v11, %v2219_v12  ;;  %v2071_v0 = vor.u32 %v2070_v5, %v2069_v16  ;;  %v2081_v18 = vshll.u32 %v2767_v40, %v2066_v1 }
 0x575   :  { %v2036_v28 = vsel %vm1949_vm12, %v3894_v14, %v2033_v50  ;;  %v2074_v57 = vor.u32 %v2073_v20, %v2072_v43  ;;  %v2077_v29 = vor.u32 %v2076_v52, %v2075_v23  ;;  %vm2087_vm15 = vcmp.lt.s32.totalorder %v2065_v58, 4 }
 0x576   :  { %2746 = vcosq.f32 %v2036_v28  ;;  %v2222_v30 = vsub.s32 0, %v4052_v37  ;;  %vm2040_vm0 = vweird.f32 %v3894_v14  ;;  %vm2043_vm1 = vcmp.lt.s32.totalorder %v2042_v2, 2 }
 0x577   :  { %2748 = vsinq.f32 %v2036_v28  ;;  %v2083_v47 = vor.u32 %v2082_v35, %v2081_v18  ;;  %v2093_v19 = vsel %vm2087_vm15, %v2080_v62, 920167782  ;;  %vm2044_vm2 = vcmp.eq.s32.totalorder %v2042_v2, 0 }
 0x578   :  { %v2426_v38 = vmin.u32 %v2222_v30, %v4052_v37  ;;  %vm2047_vm3 = vcmp.eq.s32.totalorder %v2042_v2, 2  ;;  %v1920_v36 = vsub.s32 4294967266, %v4061_v24  ;;  %vm2084_vm4 = vcmp.lt.s32.totalorder %v2065_v58, 1 }
 0x579   :  { %vm2086_vm5 = vcmp.lt.s32.totalorder %v2065_v58, 3  ;;  %v2100_v40 = vshll.u32 %v2060_v54, 8  ;;  %v2092_v22 = vsel %vm2084_vm4, %v2071_v0, %v2074_v57  ;;  %vm2085_vm6 = vcmp.lt.s32.totalorder %v2065_v58, 2 }
 0x57a   :  { %v2224_v15 = vclz %v2426_v38  ;;  %v2094_v34 = vsel %vm2086_vm5, %v2077_v29, %v2093_v19  ;;  %v2096_v42 = vsel %vm2084_vm4, %v2074_v57, %v2077_v29  ;;  %v2097_v21 = vsel %vm2087_vm15, %v2083_v47, 1326507024 }
 0x57b   :  { %v2089_v13 = vsel %vm2087_vm15, %v2077_v29, 2102212464  ;;  %v2098_v11 = vsel %vm2086_vm5, %v2080_v62, %v2097_v21  ;;  %v2068_v50 = vshrl.u32 %v2763_v31, %v2067_v46  ;;  %v2095_v56 = vsel %vm2085_vm6, %v2092_v22, %v2094_v34 }
 0x57c   :  { %v2427_v32 = vadd.s32 4294967294, %v2224_v15  ;;  %v2099_v55 = vsel %vm2085_vm6, %v2096_v42, %v2098_v11  ;;  %v1921_v51 = vadd.s32 127, %v1920_v36  ;;  %v2090_v27 = vsel %vm2086_vm5, %v2074_v57, %v2089_v13 }
 0x57d   :  { %v2088_v12 = vsel %vm2084_vm4, %v2068_v50, %v2071_v0  ;;  %v4085_v5 = vmul.u32.u64.low %v2100_v40, %v2099_v55  ;;  %v4086_v9 = vmul.u32.u64.high %v2100_v40, %v2099_v55, %v4085_v5  ;;  %v1916_v61 = vsub.s32 32, %v4061_v24 }
 0x57e   :  { %vm2428_vm7 = vcmp.lt.s32.totalorder %v2427_v32, 0  ;;  %v4089_v31 = vmul.u32.u64.low %v2100_v40, %v2095_v56  ;;  %v4090_v46 = vmul.u32.u64.high %v2100_v40, %v2095_v56, %v4089_v31  ;;  %v1900_v14 = vadd.s32 %v3971_v17, %v3977_v53 }
 0x57f   :  { %v2227_v49 = vsel %vm2428_vm7, 0, %v2427_v32  ;;  %v1922_v52 = vshll.u32 %v1921_v51, 23  ;;  %v2091_v2 = vsel %vm2085_vm6, %v2088_v12, %v2090_v27  ;;  %v1917_v43 = vshll.u32 %v4013_v48, %v4061_v24 }
 0x580   :  { %v2747_v33 = vpop.eup %2746  ;;  %v2232_v20 = vsub.s32 4294967266, %v2227_v49  ;;  %vm2109_vm14 = vc.u32 %v4086_v9, %v4089_v31  ;;  %v1918_v16 = vshrl.u32 %v1900_v14, %v1916_v61  ;;  %v2110_v62 = vadd.s32 1, %v4090_v46 }
 0x581   :  { %v2749_v39 = vpop.eup %2748  ;;  %v2048_v45 = vxor.u32 2147483648, %v2747_v33  ;;  %v2107_v30 = vmul.u32 %v2100_v40, %v2091_v2  ;;  %v1923_v23 = vor.u32 4788187, %v1922_v52  ;;  %v2228_v0 = vsub.s32 32, %v2227_v49 }
 0x582   :  { %v2045_v25 = vxor.u32 2147483648, %v2749_v39  ;;  %v2233_v35 = vadd.s32 127, %v2232_v20  ;;  %v2111_v54 = vsel %vm2109_vm14, %v2110_v62, %v4090_v46  ;;  %v1919_v38 = vor.u32 %v1918_v16, %v1917_v43 }
 0x583   :  { %v2049_v41 = vsel %vm2047_vm3, %v2048_v45, %v2749_v39  ;;  %v2112_v18 = vadd.s32 %v2111_v54, %v2107_v30  ;;  %v2212_v17 = vadd.s32 %v4024_v63, %v4029_v7  ;;  %v1924_v57 = vand.u32 2147483647, %v1923_v23 }
 0x584   :  { %v2046_v59 = vsel %vm2044_vm2, %v2747_v33, %v2045_v25  ;;  %v2234_v53 = vshll.u32 %v2233_v35, 23  ;;  %v1926_v19 = vcvt.s32.f32 %v1919_v38  ;;  %v2229_v33 = vshll.u32 %v4052_v37, %v2227_v49 }
 0x585   :  { %v2050_v1 = vsel %vm2043_vm1, %v2046_v59, %v2049_v41  ;;  %v2113_v58 = vadd.s32 536870912, %v2112_v18  ;;  %v2230_v29 = vshrl.u32 %v2212_v17, %v2228_v0  ;;  %vm1846_vm8 = vcmp.lt.s32.totalorder %v3896_v60, 0 }
 0x586   :  { %v4081_v28 = vsel %vm2040_vm0, nan, %v2050_v1  ;;  %v2235_v36 = vor.u32 4788187, %v2234_v53  ;;  %v1927_v48 = vmul.f32 %v1926_v19, %v1924_v57  ;;  %vm4108_vm9 = vcmp.le.f32.partialorder %v1844_v6, 0.7853982 }
 0x587   :  { %v2114_v47 = vshrl.u32 %v2113_v58, 30  ;;  %v2231_v24 = vor.u32 %v2230_v29, %v2229_v33  ;;  %v2108_v13 = vadd.s32 %v4089_v31, %v4086_v9  ;;  %v1930_v50 = vsub.s32 4, %v4000_v3 }
 0x588   :  { %v2236_v45 = vand.u32 2147483647, %v2235_v36  ;;  %v1928_v25 = vxor.u32 2147483648, %v1927_v48  ;;  %vm2158_vm11 = vcmp.lt.s32.totalorder %v3902_v10, 0  ;;  %vm4122_vm12 = vcmp.le.f32.partialorder %v2156_v8, 0.7853982 }
 0x589   :  { %v2115_v15 = vshll.u32 %v2114_v47, 30  ;;  %v2238_v32 = vcvt.s32.f32 %v2231_v24  ;;  %v1931_v5 = vsel %vm1846_vm8, %v1930_v50, %v4000_v3  ;;  %v2242_v31 = vsub.s32 4, %v4044_v26 }
 0x58a   :  { %v1929_v34 = vsel %vm1846_vm8, %v1928_v25, %v1927_v48  ;;  %v1933_v46 = vsel %vm4108_vm9, 0, %v1931_v5  ;;  %v2138_v52 = vsub.s32 4, %v2114_v47  ;;  %vm2054_vm13 = vcmp.lt.s32.totalorder %v3992_v4, 0 }
 0x58b   :  { %v2116_v39 = vsub.s32 %v2112_v18, %v2115_v15  ;;  %v2239_v63 = vmul.f32 %v2238_v32, %v2236_v45  ;;  %v1932_v42 = vsel %vm4108_vm9, %v3896_v60, %v1929_v34  ;;  %v1937_v16 = vadd.s32 3, %v1933_v46 }
 0x58c   :  { %2750 = vcosq.f32 %v1932_v42  ;;  %v2243_v3 = vsel %vm2158_vm11, %v2242_v31, %v4044_v26  ;;  %vm4143_vm15 = vcmp.le.f32.partialorder %v2052_v44, 0.7853982  ;;  %v2139_v54 = vsel %vm2054_vm13, %v2138_v52, %v2114_v47 }
 0x58d   :  { %v2118_v40 = vsub.s32 0, %v2116_v39  ;;  %v2240_v21 = vxor.u32 2147483648, %v2239_v63  ;;  %2752 = vsinq.f32 %v1932_v42  ;;  %v2245_v30 = vsel %vm4122_vm12, 0, %v2243_v3 }
 0x58e   :  { %v1938_v0 = vand.u32 3, %v1937_v16  ;;  %v2249_v17 = vadd.s32 3, %v2245_v30  ;;  %v2141_v53 = vsel %vm4143_vm15, 0, %v2139_v54  ;;  %vm1936_vm3 = vweird.f32 %v3896_v60 }
 0x58f   :  { %v2422_v22 = vmin.u32 %v2118_v40, %v2116_v39  ;;  %v2241_v6 = vsel %vm2158_vm11, %v2240_v21, %v2239_v63  ;;  %v2145_v47 = vadd.s32 3, %v2141_v53  ;;  %vm2248_vm9 = vweird.f32 %v3902_v10 }
 0x590   :  { %v2244_v9 = vsel %vm4122_vm12, %v3902_v10, %v2241_v6  ;;  %vm1940_vm0 = vcmp.eq.s32.totalorder %v1938_v0, 0  ;;  %vm1943_vm1 = vcmp.eq.s32.totalorder %v1938_v0, 2  ;;  %v2250_v19 = vand.u32 3, %v2249_v17 }
 0x591   :  { %v2120_v7 = vclz %v2422_v22  ;;  %2754 = vcosq.f32 %v2244_v9  ;;  %vm1939_vm2 = vcmp.lt.s32.totalorder %v1938_v0, 2  ;;  %v2146_v48 = vand.u32 3, %v2145_v47  ;;  %v2273_v22 = vpop.permute.xlu1 %2272 }
 0x592   :  { %2756 = vsinq.f32 %v2244_v9  ;;  %vm2252_vm4 = vcmp.eq.s32.totalorder %v2250_v19, 0  ;;  %vm2255_vm5 = vcmp.eq.s32.totalorder %v2250_v19, 2  ;;  %vm2251_vm6 = vcmp.lt.s32.totalorder %v2250_v19, 2 }
 0x593   :  { %v2423_v41 = vadd.s32 4294967294, %v2120_v7  ;;  %v2286_v7 = vmul.f32 %v2273_v22, %v4081_v28  ;;  %vm2151_vm7 = vcmp.eq.s32.totalorder %v2146_v48, 2  ;;  %vm2148_vm14 = vcmp.eq.s32.totalorder %v2146_v48, 0 }
 0x594   :  { %vm2147_vm8 = vcmp.lt.s32.totalorder %v2146_v48, 2 }
 0x595   :  { %vm2424_vm10 = vcmp.lt.s32.totalorder %v2423_v41, 0  ;;  %v2283_v28 = vpop.permute.xlu1 %2282 }
 0x596   :  { %v2123_v59 = vsel %vm2424_vm10, 0, %v2423_v41  ;;  %v2751_v2 = vpop.eup %2750  ;;  %vm2144_vm10 = vweird.f32 %v3992_v4 }
 0x597   :  { %v2124_v11 = vsub.s32 32, %v2123_v59  ;;  %v2128_v1 = vsub.s32 4294967266, %v2123_v59  ;;  %v2125_v56 = vshll.u32 %v2116_v39, %v2123_v59  ;;  %v2753_v35 = vpop.eup %2752  ;;  %v1944_v38 = vxor.u32 2147483648, %v2751_v2  ;;  %v2268_v39 = vpop.permute.xlu0 %2267 }
 0x598   :  { %v1941_v18 = vxor.u32 2147483648, %v2753_v35 }
 0x599   :  { %v2126_v55 = vshrl.u32 %v2108_v13, %v2124_v11  ;;  %v2129_v51 = vadd.s32 127, %v2128_v1  ;;  %v1945_v29 = vsel %vm1943_vm1, %v1944_v38, %v2753_v35 }
 0x59a   :  { %v1942_v57 = vsel %vm1940_vm0, %v2751_v2, %v1941_v18 }
 0x59b   :  { %v2127_v12 = vor.u32 %v2126_v55, %v2125_v56  ;;  %v2130_v27 = vshll.u32 %v2129_v51, 23  ;;  %v2755_v58 = vpop.eup %2754  ;;  %v1946_v15 = vsel %vm1939_vm2, %v1942_v57, %v1945_v29  ;;  %v2278_v59 = vpop.permute.xlu0 %2277  ;;  %v2303_v55 = vlaneseq }
 0x59c   :  { %v2757_v44 = vpop.eup %2756  ;;  %v2256_v36 = vxor.u32 2147483648, %v2755_v58  ;;  %v1947_v45 = vsel %vm1936_vm3, nan, %v1946_v15 }
 0x59d   :  { %v2131_v61 = vor.u32 4788187, %v2130_v27  ;;  %v2134_v20 = vcvt.s32.f32 %v2127_v12  ;;  %v2253_v33 = vxor.u32 2147483648, %v2757_v44  ;;  %v2285_v41 = vmul.f32 %v2268_v39, %v1947_v45 }
 0x59e   :  { %v2257_v25 = vsel %vm2255_vm5, %v2256_v36, %v2757_v44  ;;  %v2304_v12 = vshrl.u32 %v2303_v55, 7 }
 0x59f   :  { %v2132_v8 = vand.u32 2147483647, %v2131_v61  ;;  %v2254_v40 = vsel %vm2252_vm4, %v2755_v58, %v2253_v33  ;;  %v2289_v1 = vadd.f32 %v2286_v7, %v2285_v41  ;;  %v2301_v10 = vpop.permute.xlu0 %2300 }
 0x5a0   :  { %v2258_v37 = vsel %vm2251_vm6, %v2254_v40, %v2257_v25  ;;  %v2305_v9 = vsub.s32 0, %v2304_v12 }
 0x5a1   :  { %v2135_v14 = vmul.f32 %v2134_v20, %v2132_v8  ;;  %v2259_v13 = vsel %vm2248_vm9, nan, %v2258_v37 }
 0x5a2   :  { %v2288_v6 = vmul.f32 %v2283_v28, %v2259_v13 }
 0x5a3   :  { %v2136_v62 = vxor.u32 2147483648, %v2135_v14 }
 0x5a5   :  { %v2137_v23 = vsel %vm2054_vm13, %v2136_v62, %v2135_v14 }
 0x5a6   :  { %v2140_v26 = vsel %vm4143_vm15, %v3992_v4, %v2137_v23  ;;  %v2306_v4 = vrot.slane %v2301_v10, %v2305_v9 }
 0x5a7   :  { %2758 = vcosq.f32 %v2140_v26 }
 0x5a8   :  { %2760 = vsinq.f32 %v2140_v26 }
 0x5b1   :  { %v2759_v24 = vpop.eup %2758 }
 0x5b2   :  { %v2761_v32 = vpop.eup %2760  ;;  %v2152_v63 = vxor.u32 2147483648, %v2759_v24 }
 0x5b3   :  { %v2149_v34 = vxor.u32 2147483648, %v2761_v32 }
 0x5b4   :  { %v2153_v42 = vsel %vm2151_vm7, %v2152_v63, %v2761_v32 }
 0x5b5   :  { %v2150_v60 = vsel %vm2148_vm14, %v2759_v24, %v2149_v34 }
 0x5b6   :  { %v2154_v21 = vsel %vm2147_vm8, %v2150_v60, %v2153_v42 }
 0x5b7   :  { %v2155_v11 = vsel %vm2144_vm10, nan, %v2154_v21 }
 0x5b8   :  { %v2287_v50 = vmul.f32 %v2278_v59, %v2155_v11 }
 0x5ba   :  { %v2290_v56 = vadd.f32 %v2289_v1, %v2287_v50 }
 0x5bc   :  { %v2291_v51 = vadd.f32 %v2290_v56, %v2288_v6 }
 0x5be   :  { %v2292_v49 = vrot.slane %v2291_v51, 4 }
 0x5c0   :  { %v2293_v27 = vadd.f32 %v2292_v49, %v2291_v51 }
 0x5c2   :  { %v2294_v5 = vrot.slane %v2293_v27, 2 }
 0x5c4   :  { %v2295_v61 = vadd.f32 %v2294_v5, %v2293_v27 }
 0x5c6   :  { %v2296_v31 = vrot.slane %v2295_v61, 1 }
 0x5c8   :  { %v2297_v46 = vadd.f32 %v2296_v31, %v2295_v61 }
 0x5ca   :  { %v2307_v8 = vadd.f32 %v2306_v4, %v2297_v46 }
 0x5cc   :  { %2308 = vst [vmem:[%s4165_s6] sm:$0x1] %v2307_v8 }

</bundles_post_ra>
